<compile_context>
chip_gen: v7x
topology: tpu7x:2x2x1
jax: 0.10.0
libtpu: 0.0.40
codegen_flags: <defaults>
</compile_context>

<pallas_src>
import math

import jax
import jax.numpy as jnp
from jax import lax
from jax.experimental import pallas as pl
from jax.experimental.pallas import tpu as pltpu

NEG_SLOPE = 0.2
ACT_SCALE = math.sqrt(2.0)
INV_SQRT2 = 1.0 / math.sqrt(2.0)

TM_MAX = 512                    # output-row tile (pixels per grid step)
K_CHUNK_MAX = 4608              # max contraction tile (36*128) ~ 4.5 MiB bf16 block
LANE = 128                      # lane-dense output-channel padding
VMEM_LIMIT = 48 * 1024 * 1024   # under v7x's 64 MiB physical VMEM, ample on v5e/v6e


def _round_up(x, m):
    return (x + m - 1) // m * m


def _pick_k_chunk(k):
    """Largest divisor of k that is a multiple of 128 and <= K_CHUNK_MAX (else k)."""
    if k <= K_CHUNK_MAX:
        return k
    for c in range(K_CHUNK_MAX, 0, -128):
        if k % c == 0:
            return c
    return k


# ---------------------------------------------------------------------------
# Pallas kernel: K-tiled matmul with f32 VMEM accumulator and fused epilogue
# (bias add, leaky-relu, residual add); all static scales pre-folded.
# ---------------------------------------------------------------------------
def _make_kernel(*, activate, has_bias, has_residual):
    def kernel(*refs):
        i = 0
        x_ref = refs[i]; i += 1
        w_ref = refs[i]; i += 1
        b_ref = None
        r_ref = None
        if has_bias:
            b_ref = refs[i]; i += 1
        if has_residual:
            r_ref = refs[i]; i += 1
        o_ref = refs[i]; i += 1
        acc_ref = refs[i]

        k = pl.program_id(1)

        @pl.when(k == 0)
        def _zero():
            acc_ref[...] = jnp.zeros_like(acc_ref)

        acc_ref[...] += jnp.dot(x_ref[...], w_ref[...],
                                preferred_element_type=jnp.float32)

        @pl.when(k == pl.num_programs(1) - 1)
        def _epilogue():
            acc = acc_ref[...]
            if has_bias:
                acc = acc + b_ref[...]
            if activate:
                acc = jnp.where(acc >= 0.0, acc, NEG_SLOPE * acc)
            if has_residual:
                acc = acc + r_ref[...].astype(jnp.float32)
            o_ref[...] = acc.astype(o_ref.dtype)

    return kernel


def conv_mm(patches, w_mat, *, bias=None, residual=None, activate=False,
            out_dtype=jnp.float32):
    """Fused (im2col) conv: out = epilogue(patches @ w_mat).

    patches : (M, K)   bf16  (scales pre-folded into w_mat)
    w_mat   : (K, Cp)  bf16, Cp a multiple of 128 (lane-dense)
    bias    : (1, Cp)  f32 or None  (added before leaky-relu)
    residual: (Mp, Cp) f32 or None  (added after activation)
    Returns (Mp, Cp) `out_dtype`; caller slices rows/lanes as needed.
    """
    M, K = patches.shape
    Kw, Cp = w_mat.shape
    assert K == Kw and Cp % LANE == 0

    tm = min(TM_MAX, _round_up(M, 8))
    m_pad = _round_up(M, tm)
    if m_pad != M:
        patches = jnp.pad(patches, ((0, m_pad - M), (0, 0)))
    if residual is not None:
        assert residual.shape[1] == Cp and residual.shape[0] <= m_pad
        if residual.shape[0] != m_pad:
            residual = jnp.pad(residual, ((0, m_pad - residual.shape[0]), (0, 0)))

    tk = _pick_k_chunk(K)
    grid = (m_pad // tm, K // tk)

    kernel = _make_kernel(activate=activate, has_bias=bias is not None,
                          has_residual=residual is not None)

    inputs = [patches, w_mat]
    in_specs = [
        pl.BlockSpec((tm, tk), lambda i, k: (i, k)),
        pl.BlockSpec((tk, Cp), lambda i, k: (k, 0)),
    ]
    if bias is not None:
        inputs.append(bias)
        in_specs.append(pl.BlockSpec((1, Cp), lambda i, k: (0, 0)))
    if residual is not None:
        inputs.append(residual)
        in_specs.append(pl.BlockSpec((tm, Cp), lambda i, k: (i, 0)))

    return pl.pallas_call(
        kernel,
        out_shape=jax.ShapeDtypeStruct((m_pad, Cp), out_dtype),
        grid=grid,
        in_specs=in_specs,
        out_specs=pl.BlockSpec((tm, Cp), lambda i, k: (i, 0)),
        scratch_shapes=[pltpu.VMEM((tm, Cp), jnp.float32)],
        compiler_params=pltpu.CompilerParams(
            dimension_semantics=("parallel", "arbitrary"),
            vmem_limit_bytes=VMEM_LIMIT),
    )(*inputs)


# ---------------------------------------------------------------------------
# JAX glue: im2col, blur folding, weight prep, full ResBlock forward
# ---------------------------------------------------------------------------
def im2col(xp, kh, kw, stride):
    """xp: padded NHWC -> (N*Ho*Wo, kh*kw*C) patches (same dtype as xp)."""
    N, Hp, Wp, C = xp.shape
    Ho = (Hp - kh) // stride + 1
    Wo = (Wp - kw) // stride + 1
    cols = []
    for dh in range(kh):
        for dw in range(kw):
            cols.append(xp[:, dh:dh + (Ho - 1) * stride + 1:stride,
                           dw:dw + (Wo - 1) * stride + 1:stride, :])
    patches = jnp.stack(cols, axis=3)                # (N, Ho, Wo, kh*kw, C)
    return patches.reshape(N * Ho * Wo, kh * kw * C), (N, Ho, Wo, C)


def _blur_kernel_2d():
    k = jnp.array([1.0, 3.0, 3.0, 1.0], jnp.float32)
    k2 = k[:, None] * k[None, :]
    return k2 / jnp.sum(k2)   # symmetric -> upfirdn2d's kernel flip is a no-op


def _fold_blur(w, k2):
    """Fold the depthwise 4x4 FIR blur into a conv weight.

    blur (pad such that output shrinks by 3) followed by a (kh,kw) conv equals a
    single (kh+3, kw+3) conv with  w_eff[..,u,v] = sum_{p,q} w[..,p,q]*k2[u-p,v-q].
    """
    cout, cin, kh, kw = w.shape
    eff = jnp.zeros((cout, cin, kh + 3, kw + 3), jnp.float32)
    for p in range(kh):
        for q in range(kw):
            eff = eff.at[:, :, p:p + 4, q:q + 4].add(
                w[:, :, p, q, None, None] * k2)
    return eff


def _weight_to_mat(w, cpad, scale):
    """(Cout,Cin,KH,KW)*scale -> (KH*KW*Cin, cpad) bf16, matching im2col order."""
    cout, cin, kh, kw = w.shape
    m = jnp.transpose(w * scale, (2, 3, 1, 0)).reshape(kh * kw * cin, cout)
    if cpad != cout:
        m = jnp.pad(m, ((0, 0), (0, cpad - cout)))
    return m.astype(jnp.bfloat16)


def _bias_row(b, cpad, scale):
    b = (b * scale).astype(jnp.float32)
    if cpad != b.shape[0]:
        b = jnp.pad(b, (0, cpad - b.shape[0]))
    return b.reshape(1, cpad)


def resblock_forward(x_nchw, params):
    x = jnp.transpose(x_nchw, (0, 2, 3, 1)).astype(jnp.bfloat16)   # NHWC bf16
    N, H, W, Cin = x.shape
    Cout = params["w2"].shape[0]
    cin_p = _round_up(Cin, LANE)
    cout_p = _round_up(Cout, LANE)
    k2 = _blur_kernel_2d()

    # Weight / bias prep: blur folded, EqualConv scale + sqrt(2) activation scale
    # + final 1/sqrt(2) all folded into the bf16 weight slabs / f32 biases.
    w1m = _weight_to_mat(params["w1"], cin_p, ACT_SCALE / math.sqrt(Cin * 9))
    b1 = _bias_row(params["b1"], cin_p, ACT_SCALE)

    w2eff = _fold_blur(params["w2"], k2)                     # (Cout, Cin, 6, 6)
    w2m = _weight_to_mat(w2eff, cout_p,
                         ACT_SCALE * INV_SQRT2 / math.sqrt(Cin * 9))
    b2 = _bias_row(params["b2"], cout_p, ACT_SCALE * INV_SQRT2)

    wkeff = _fold_blur(params["wk"], k2)                     # (Cout, Cin, 4, 4)
    wkm = _weight_to_mat(wkeff, cout_p, INV_SQRT2 / math.sqrt(Cin * 1))

    # Shared pad-by-1 input (used by conv1 and the folded skip conv).
    xp1 = jnp.pad(x, ((0, 0), (1, 1), (1, 1), (0, 0)))

    # conv1: 3x3 stride 1 pad 1, Cin->Cin, bias + leaky_relu*sqrt(2).
    p1, (_, H1, W1, _) = im2col(xp1, 3, 3, 1)
    o1 = conv_mm(p1, w1m, bias=b1, activate=True, out_dtype=jnp.bfloat16)
    o1 = o1[:N * H1 * W1, :Cin].reshape(N, H1, W1, Cin)

    # conv2 (blur folded): 6x6 stride 2 pad 2, Cin->Cout, bias + leaky_relu,
    # pre-divided by sqrt(2) via the folded weight/bias scales.
    o1p = jnp.pad(o1, ((0, 0), (2, 2), (2, 2), (0, 0)))
    p2, (_, H2, W2, _) = im2col(o1p, 6, 6, 2)
    o2 = conv_mm(p2, w2m, bias=b2, activate=True, out_dtype=jnp.float32)

    # skip (blur folded): 4x4 stride 2 pad 1, Cin->Cout, no bias/act,
    # pre-divided by sqrt(2); residual (o2) added inside the kernel.
    pk, (_, Hk, Wk, _) = im2col(xp1, 4, 4, 2)
    assert (H2, W2) == (Hk, Wk)
    out = conv_mm(pk, wkm, residual=o2, out_dtype=jnp.float32)

    out = out[:N * Hk * Wk, :Cout].reshape(N, Hk, Wk, Cout)
    return jnp.transpose(out, (0, 3, 1, 2)).astype(x_nchw.dtype)   # -> NCHW


# ---------------------------------------------------------------------------
# Pure-JAX (lax.conv) reference, mirroring the original PyTorch module
# ---------------------------------------------------------------------------
def _flru_ref(x, b):
    x = x + b[None, :, None, None]
    return jnp.where(x >= 0, x, NEG_SLOPE * x) * ACT_SCALE


def resblock_ref(x, params):
    Cin = x.shape[1]
    dn = ("NCHW", "OIHW", "NCHW")
    hi = lax.Precision.HIGHEST
    k2 = _blur_kernel_2d()
    kw_dw = jnp.tile(k2[None, None], (Cin, 1, 1, 1))

    o = lax.conv_general_dilated(x, params["w1"] / math.sqrt(Cin * 9), (1, 1),
                                 ((1, 1), (1, 1)), dimension_numbers=dn,
                                 precision=hi)
    o = _flru_ref(o, params["b1"])
    ob = lax.conv_general_dilated(o, kw_dw, (1, 1), ((2, 2), (2, 2)),
                                  dimension_numbers=dn,
                                  feature_group_count=Cin, precision=hi)
    o2 = lax.conv_general_dilated(ob, params["w2"] / math.sqrt(Cin * 9), (2, 2),
                                  ((0, 0), (0, 0)), dimension_numbers=dn,
                                  precision=hi)
    o2 = _flru_ref(o2, params["b2"])
    sb = lax.conv_general_dilated(x, kw_dw, (1, 1), ((1, 1), (1, 1)),
                                  dimension_numbers=dn,
                                  feature_group_count=Cin, precision=hi)
    skip = lax.conv_general_dilated(sb, params["wk"] / math.sqrt(Cin), (2, 2),
                                    ((0, 0), (0, 0)), dimension_numbers=dn,
                                    precision=hi)
    return (o2 + skip) / math.sqrt(2.0)


if __name__ == "__main__":
    N, Cin, Cout, HW = 2, 4, 8, 16
    key = jax.random.PRNGKey(0)
    kx, kw1, kw2, kwk, kb1, kb2 = jax.random.split(key, 6)
    x = jax.random.normal(kx, (N, Cin, HW, HW), jnp.float32)
    params = {
        "w1": jax.random.normal(kw1, (Cin, Cin, 3, 3), jnp.float32),
        "b1": 0.1 * jax.random.normal(kb1, (Cin,), jnp.float32),
        "w2": jax.random.normal(kw2, (Cout, Cin, 3, 3), jnp.float32),
        "b2": 0.1 * jax.random.normal(kb2, (Cout,), jnp.float32),
        "wk": jax.random.normal(kwk, (Cout, Cin, 1, 1), jnp.float32),
    }

    out = jax.block_until_ready(jax.jit(resblock_forward)(x, params))
    ref = resblock_ref(x, params)

    assert out.shape == (N, Cout, HW // 2, HW // 2), out.shape
    rel_err = float(jnp.max(jnp.abs(out - ref)) /
                    (jnp.max(jnp.abs(ref)) + 1e-6))
    # bf16 MXU operands (f32 accumulation/epilogue): expect ~1e-3..1e-2 rel err.
    assert rel_err < 3e-2, f"mismatch vs reference: rel_err={rel_err}"
    print("KERNEL_OK")
</pallas_src>

<mosaic_0001>
module attributes {stable_mosaic.version = 11 : i64} {
  func.func @kernel(%arg0: i32, %arg1: i32, %arg2: memref<512x36xbf16, #tpu.memory_space<vmem>>, %arg3: memref<36x128xbf16, #tpu.memory_space<vmem>>, %arg4: memref<1x128xf32, #tpu.memory_space<vmem>>, %arg5: memref<512x128xbf16, #tpu.memory_space<vmem>>, %arg6: memref<512x128xf32, #tpu.memory_space<vmem>>) attributes {dimension_semantics = [#tpu.dimension_semantics<parallel>, #tpu.dimension_semantics<arbitrary>], iteration_bounds = array<i64: 1, 1>, scalar_prefetch = 0 : i64, scratch_operands = 1 : i64, tpu.core_type = #tpu.core_type<tc>, window_params = [{transform_indices = @transform_0, window_bounds = array<i64: 512, 36>}, {transform_indices = @transform_1, window_bounds = array<i64: 36, 128>}, {pipeline_mode = #tpu.pipeline_mode<synchronous>, transform_indices = @transform_2, window_bounds = array<i64: 1, 128>}, {transform_indices = @transform_3, window_bounds = array<i64: 512, 128>}]} {
    %c0_i32 = arith.constant 0 : i32
    %0 = arith.cmpi eq, %arg1, %c0_i32 : i32
    %1 = arith.extui %0 : i1 to i32
    %c0_i32_0 = arith.constant 0 : i32
    %2 = arith.cmpi ne, %1, %c0_i32_0 : i32
    scf.if %2 {
      %cst_10 = arith.constant 0.000000e+00 : f32
      %12 = vector.broadcast %cst_10 : f32 to vector<512x128xf32>
      %c0_11 = arith.constant 0 : index
      %c0_12 = arith.constant 0 : index
      %13 = vector.load %arg6[%c0_11, %c0_12] : memref<512x128xf32, #tpu.memory_space<vmem>>, vector<512x128xf32>
      tpu.vector_store %arg6[%c0_11, %c0_12], %12 {strides = array<i32>} : memref<512x128xf32, #tpu.memory_space<vmem>>, vector<512x128xf32>,
    } else {
    }
    %c0 = arith.constant 0 : index
    %c0_1 = arith.constant 0 : index
    %3 = vector.load %arg6[%c0, %c0_1] : memref<512x128xf32, #tpu.memory_space<vmem>>, vector<512x128xf32>
    %c0_2 = arith.constant 0 : index
    %c0_3 = arith.constant 0 : index
    %4 = vector.load %arg2[%c0_2, %c0_3] : memref<512x36xbf16, #tpu.memory_space<vmem>>, vector<512x36xbf16>
    %c0_4 = arith.constant 0 : index
    %c0_5 = arith.constant 0 : index
    %5 = vector.load %arg3[%c0_4, %c0_5] : memref<36x128xbf16, #tpu.memory_space<vmem>>, vector<36x128xbf16>
    %cst = arith.constant dense<0.000000e+00> : vector<512x128xf32>
    %6 = tpu.matmul %4, %5, %cst {dimension_numbers = #tpu.dot_dimension_numbers<[1], [0], [0], [1], [0, 0, 1, 1], [], []>} : vector<512x36xbf16>, vector<36x128xbf16>, vector<512x128xf32> -> vector<512x128xf32>
    %7 = arith.addf %3, %6 : vector<512x128xf32>
    %c0_6 = arith.constant 0 : index
    %c0_7 = arith.constant 0 : index
    %8 = vector.load %arg6[%c0_6, %c0_7] : memref<512x128xf32, #tpu.memory_space<vmem>>, vector<512x128xf32>
    tpu.vector_store %arg6[%c0_6, %c0_7], %7 {strides = array<i32>} : memref<512x128xf32, #tpu.memory_space<vmem>>, vector<512x128xf32>,
    %c0_i32_8 = arith.constant 0 : i32
    %9 = arith.cmpi eq, %arg1, %c0_i32_8 : i32
    %10 = arith.extui %9 : i1 to i32
    %c0_i32_9 = arith.constant 0 : i32
    %11 = arith.cmpi ne, %10, %c0_i32_9 : i32
    scf.if %11 {
      %c0_10 = arith.constant 0 : index
      %c0_11 = arith.constant 0 : index
      %12 = vector.load %arg6[%c0_10, %c0_11] : memref<512x128xf32, #tpu.memory_space<vmem>>, vector<512x128xf32>
      %c0_12 = arith.constant 0 : index
      %c0_13 = arith.constant 0 : index
      %13 = vector.load %arg4[%c0_12, %c0_13] : memref<1x128xf32, #tpu.memory_space<vmem>>, vector<1x128xf32>
      %14 = vector.broadcast %13 : vector<1x128xf32> to vector<512x128xf32>
      %15 = arith.addf %12, %14 : vector<512x128xf32>
      %cst_14 = arith.constant 0.000000e+00 : f32
      %16 = vector.broadcast %cst_14 : f32 to vector<512x128xf32>
      %17 = arith.cmpf oge, %15, %16 : vector<512x128xf32>
      %cst_15 = arith.constant 2.000000e-01 : f32
      %18 = vector.broadcast %cst_15 : f32 to vector<512x128xf32>
      %19 = arith.mulf %18, %15 : vector<512x128xf32>
      %20 = arith.select %17, %15, %19 : vector<512x128xi1>, vector<512x128xf32>
      %21 = arith.truncf %20 : vector<512x128xf32> to vector<512x128xbf16>
      %c0_16 = arith.constant 0 : index
      %c0_17 = arith.constant 0 : index
      %22 = vector.load %arg5[%c0_16, %c0_17] : memref<512x128xbf16, #tpu.memory_space<vmem>>, vector<512x128xbf16>
      tpu.vector_store %arg5[%c0_16, %c0_17], %21 {strides = array<i32>} : memref<512x128xbf16, #tpu.memory_space<vmem>>, vector<512x128xbf16>,
    } else {
    }
    return
  }
  func.func @transform_0(%arg0: i32, %arg1: i32) -> (i32, i32) {
    %c0_i32 = arith.constant 0 : i32
    return %arg0, %arg1 : i32, i32
  }
  func.func @transform_1(%arg0: i32, %arg1: i32) -> (i32, i32) {
    %c0_i32 = arith.constant 0 : i32
    %c0_i32_0 = arith.constant 0 : i32
    return %arg1, %c0_i32 : i32, i32
  }
  func.func @transform_2(%arg0: i32, %arg1: i32) -> (i32, i32) {
    %c0_i32 = arith.constant 0 : i32
    %c0_i32_0 = arith.constant 0 : i32
    %c0_i32_1 = arith.constant 0 : i32
    return %c0_i32, %c0_i32_0 : i32, i32
  }
  func.func @transform_3(%arg0: i32, %arg1: i32) -> (i32, i32) {
    %c0_i32 = arith.constant 0 : i32
    %c0_i32_0 = arith.constant 0 : i32
    return %arg0, %c0_i32 : i32, i32
  }
}

module attributes {stable_mosaic.version = 11 : i64} {
  func.func @kernel(%arg0: i32, %arg1: i32, %arg2: memref<128x144xbf16, #tpu.memory_space<vmem>>, %arg3: memref<144x128xbf16, #tpu.memory_space<vmem>>, %arg4: memref<1x128xf32, #tpu.memory_space<vmem>>, %arg5: memref<128x128xf32, #tpu.memory_space<vmem>>, %arg6: memref<128x128xf32, #tpu.memory_space<vmem>>) attributes {dimension_semantics = [#tpu.dimension_semantics<parallel>, #tpu.dimension_semantics<arbitrary>], iteration_bounds = array<i64: 1, 1>, scalar_prefetch = 0 : i64, scratch_operands = 1 : i64, tpu.core_type = #tpu.core_type<tc>, window_params = [{transform_indices = @transform_0, window_bounds = array<i64: 128, 144>}, {transform_indices = @transform_1, window_bounds = array<i64: 144, 128>}, {pipeline_mode = #tpu.pipeline_mode<synchronous>, transform_indices = @transform_2, window_bounds = array<i64: 1, 128>}, {transform_indices = @transform_3, window_bounds = array<i64: 128, 128>}]} {
    %c0_i32 = arith.constant 0 : i32
    %0 = arith.cmpi eq, %arg1, %c0_i32 : i32
    %1 = arith.extui %0 : i1 to i32
    %c0_i32_0 = arith.constant 0 : i32
    %2 = arith.cmpi ne, %1, %c0_i32_0 : i32
    scf.if %2 {
      %cst_10 = arith.constant 0.000000e+00 : f32
      %12 = vector.broadcast %cst_10 : f32 to vector<128x128xf32>
      %c0_11 = arith.constant 0 : index
      %c0_12 = arith.constant 0 : index
      %13 = vector.load %arg6[%c0_11, %c0_12] : memref<128x128xf32, #tpu.memory_space<vmem>>, vector<128x128xf32>
      tpu.vector_store %arg6[%c0_11, %c0_12], %12 {strides = array<i32>} : memref<128x128xf32, #tpu.memory_space<vmem>>, vector<128x128xf32>,
    } else {
    }
    %c0 = arith.constant 0 : index
    %c0_1 = arith.constant 0 : index
    %3 = vector.load %arg6[%c0, %c0_1] : memref<128x128xf32, #tpu.memory_space<vmem>>, vector<128x128xf32>
    %c0_2 = arith.constant 0 : index
    %c0_3 = arith.constant 0 : index
    %4 = vector.load %arg2[%c0_2, %c0_3] : memref<128x144xbf16, #tpu.memory_space<vmem>>, vector<128x144xbf16>
    %c0_4 = arith.constant 0 : index
    %c0_5 = arith.constant 0 : index
    %5 = vector.load %arg3[%c0_4, %c0_5] : memref<144x128xbf16, #tpu.memory_space<vmem>>, vector<144x128xbf16>
    %cst = arith.constant dense<0.000000e+00> : vector<128x128xf32>
    %6 = tpu.matmul %4, %5, %cst {dimension_numbers = #tpu.dot_dimension_numbers<[1], [0], [0], [1], [0, 0, 1, 1], [], []>} : vector<128x144xbf16>, vector<144x128xbf16>, vector<128x128xf32> -> vector<128x128xf32>
    %7 = arith.addf %3, %6 : vector<128x128xf32>
    %c0_6 = arith.constant 0 : index
    %c0_7 = arith.constant 0 : index
    %8 = vector.load %arg6[%c0_6, %c0_7] : memref<128x128xf32, #tpu.memory_space<vmem>>, vector<128x128xf32>
    tpu.vector_store %arg6[%c0_6, %c0_7], %7 {strides = array<i32>} : memref<128x128xf32, #tpu.memory_space<vmem>>, vector<128x128xf32>,
    %c0_i32_8 = arith.constant 0 : i32
    %9 = arith.cmpi eq, %arg1, %c0_i32_8 : i32
    %10 = arith.extui %9 : i1 to i32
    %c0_i32_9 = arith.constant 0 : i32
    %11 = arith.cmpi ne, %10, %c0_i32_9 : i32
    scf.if %11 {
      %c0_10 = arith.constant 0 : index
      %c0_11 = arith.constant 0 : index
      %12 = vector.load %arg6[%c0_10, %c0_11] : memref<128x128xf32, #tpu.memory_space<vmem>>, vector<128x128xf32>
      %c0_12 = arith.constant 0 : index
      %c0_13 = arith.constant 0 : index
      %13 = vector.load %arg4[%c0_12, %c0_13] : memref<1x128xf32, #tpu.memory_space<vmem>>, vector<1x128xf32>
      %14 = vector.broadcast %13 : vector<1x128xf32> to vector<128x128xf32>
      %15 = arith.addf %12, %14 : vector<128x128xf32>
      %cst_14 = arith.constant 0.000000e+00 : f32
      %16 = vector.broadcast %cst_14 : f32 to vector<128x128xf32>
      %17 = arith.cmpf oge, %15, %16 : vector<128x128xf32>
      %cst_15 = arith.constant 2.000000e-01 : f32
      %18 = vector.broadcast %cst_15 : f32 to vector<128x128xf32>
      %19 = arith.mulf %18, %15 : vector<128x128xf32>
      %20 = arith.select %17, %15, %19 : vector<128x128xi1>, vector<128x128xf32>
      %c0_16 = arith.constant 0 : index
      %c0_17 = arith.constant 0 : index
      %21 = vector.load %arg5[%c0_16, %c0_17] : memref<128x128xf32, #tpu.memory_space<vmem>>, vector<128x128xf32>
      tpu.vector_store %arg5[%c0_16, %c0_17], %20 {strides = array<i32>} : memref<128x128xf32, #tpu.memory_space<vmem>>, vector<128x128xf32>,
    } else {
    }
    return
  }
  func.func @transform_0(%arg0: i32, %arg1: i32) -> (i32, i32) {
    %c0_i32 = arith.constant 0 : i32
    return %arg0, %arg1 : i32, i32
  }
  func.func @transform_1(%arg0: i32, %arg1: i32) -> (i32, i32) {
    %c0_i32 = arith.constant 0 : i32
    %c0_i32_0 = arith.constant 0 : i32
    return %arg1, %c0_i32 : i32, i32
  }
  func.func @transform_2(%arg0: i32, %arg1: i32) -> (i32, i32) {
    %c0_i32 = arith.constant 0 : i32
    %c0_i32_0 = arith.constant 0 : i32
    %c0_i32_1 = arith.constant 0 : i32
    return %c0_i32, %c0_i32_0 : i32, i32
  }
  func.func @transform_3(%arg0: i32, %arg1: i32) -> (i32, i32) {
    %c0_i32 = arith.constant 0 : i32
    %c0_i32_0 = arith.constant 0 : i32
    return %arg0, %c0_i32 : i32, i32
  }
}

module attributes {stable_mosaic.version = 11 : i64} {
  func.func @kernel(%arg0: i32, %arg1: i32, %arg2: memref<128x64xbf16, #tpu.memory_space<vmem>>, %arg3: memref<64x128xbf16, #tpu.memory_space<vmem>>, %arg4: memref<128x128xf32, #tpu.memory_space<vmem>>, %arg5: memref<128x128xf32, #tpu.memory_space<vmem>>, %arg6: memref<128x128xf32, #tpu.memory_space<vmem>>) attributes {dimension_semantics = [#tpu.dimension_semantics<parallel>, #tpu.dimension_semantics<arbitrary>], iteration_bounds = array<i64: 1, 1>, scalar_prefetch = 0 : i64, scratch_operands = 1 : i64, tpu.core_type = #tpu.core_type<tc>, window_params = [{transform_indices = @transform_0, window_bounds = array<i64: 128, 64>}, {transform_indices = @transform_1, window_bounds = array<i64: 64, 128>}, {transform_indices = @transform_2, window_bounds = array<i64: 128, 128>}, {transform_indices = @transform_3, window_bounds = array<i64: 128, 128>}]} {
    %c0_i32 = arith.constant 0 : i32
    %0 = arith.cmpi eq, %arg1, %c0_i32 : i32
    %1 = arith.extui %0 : i1 to i32
    %c0_i32_0 = arith.constant 0 : i32
    %2 = arith.cmpi ne, %1, %c0_i32_0 : i32
    scf.if %2 {
      %cst_10 = arith.constant 0.000000e+00 : f32
      %12 = vector.broadcast %cst_10 : f32 to vector<128x128xf32>
      %c0_11 = arith.constant 0 : index
      %c0_12 = arith.constant 0 : index
      %13 = vector.load %arg6[%c0_11, %c0_12] : memref<128x128xf32, #tpu.memory_space<vmem>>, vector<128x128xf32>
      tpu.vector_store %arg6[%c0_11, %c0_12], %12 {strides = array<i32>} : memref<128x128xf32, #tpu.memory_space<vmem>>, vector<128x128xf32>,
    } else {
    }
    %c0 = arith.constant 0 : index
    %c0_1 = arith.constant 0 : index
    %3 = vector.load %arg6[%c0, %c0_1] : memref<128x128xf32, #tpu.memory_space<vmem>>, vector<128x128xf32>
    %c0_2 = arith.constant 0 : index
    %c0_3 = arith.constant 0 : index
    %4 = vector.load %arg2[%c0_2, %c0_3] : memref<128x64xbf16, #tpu.memory_space<vmem>>, vector<128x64xbf16>
    %c0_4 = arith.constant 0 : index
    %c0_5 = arith.constant 0 : index
    %5 = vector.load %arg3[%c0_4, %c0_5] : memref<64x128xbf16, #tpu.memory_space<vmem>>, vector<64x128xbf16>
    %cst = arith.constant dense<0.000000e+00> : vector<128x128xf32>
    %6 = tpu.matmul %4, %5, %cst {dimension_numbers = #tpu.dot_dimension_numbers<[1], [0], [0], [1], [0, 0, 1, 1], [], []>} : vector<128x64xbf16>, vector<64x128xbf16>, vector<128x128xf32> -> vector<128x128xf32>
    %7 = arith.addf %3, %6 : vector<128x128xf32>
    %c0_6 = arith.constant 0 : index
    %c0_7 = arith.constant 0 : index
    %8 = vector.load %arg6[%c0_6, %c0_7] : memref<128x128xf32, #tpu.memory_space<vmem>>, vector<128x128xf32>
    tpu.vector_store %arg6[%c0_6, %c0_7], %7 {strides = array<i32>} : memref<128x128xf32, #tpu.memory_space<vmem>>, vector<128x128xf32>,
    %c0_i32_8 = arith.constant 0 : i32
    %9 = arith.cmpi eq, %arg1, %c0_i32_8 : i32
    %10 = arith.extui %9 : i1 to i32
    %c0_i32_9 = arith.constant 0 : i32
    %11 = arith.cmpi ne, %10, %c0_i32_9 : i32
    scf.if %11 {
      %c0_10 = arith.constant 0 : index
      %c0_11 = arith.constant 0 : index
      %12 = vector.load %arg6[%c0_10, %c0_11] : memref<128x128xf32, #tpu.memory_space<vmem>>, vector<128x128xf32>
      %c0_12 = arith.constant 0 : index
      %c0_13 = arith.constant 0 : index
      %13 = vector.load %arg4[%c0_12, %c0_13] : memref<128x128xf32, #tpu.memory_space<vmem>>, vector<128x128xf32>
      %14 = arith.addf %12, %13 : vector<128x128xf32>
      %c0_14 = arith.constant 0 : index
      %c0_15 = arith.constant 0 : index
      %15 = vector.load %arg5[%c0_14, %c0_15] : memref<128x128xf32, #tpu.memory_space<vmem>>, vector<128x128xf32>
      tpu.vector_store %arg5[%c0_14, %c0_15], %14 {strides = array<i32>} : memref<128x128xf32, #tpu.memory_space<vmem>>, vector<128x128xf32>,
    } else {
    }
    return
  }
  func.func @transform_0(%arg0: i32, %arg1: i32) -> (i32, i32) {
    %c0_i32 = arith.constant 0 : i32
    return %arg0, %arg1 : i32, i32
  }
  func.func @transform_1(%arg0: i32, %arg1: i32) -> (i32, i32) {
    %c0_i32 = arith.constant 0 : i32
    %c0_i32_0 = arith.constant 0 : i32
    return %arg1, %c0_i32 : i32, i32
  }
  func.func @transform_2(%arg0: i32, %arg1: i32) -> (i32, i32) {
    %c0_i32 = arith.constant 0 : i32
    %c0_i32_0 = arith.constant 0 : i32
    return %arg0, %c0_i32 : i32, i32
  }
  func.func @transform_3(%arg0: i32, %arg1: i32) -> (i32, i32) {
    %c0_i32 = arith.constant 0 : i32
    %c0_i32_0 = arith.constant 0 : i32
    return %arg0, %c0_i32 : i32, i32
  }
}

</mosaic_0001>

<bundles_post_ra>
// kernel: resblock_forward.3
= control target key start
LH: loop header
LB: loop body
LE: loop exit
PB: predicated region body
PF: predicated region fallthrough
CT: control target
= control target key end

     0   :  { %vm391_vm0 = vcmask 293888   ;;  %vm488_vm1 = vcmask 1041408   ;;  %s2429_s1 = inlined_call_operand.vmem [shape: bf16[36,128], index: 1, kind: input, shape index: {}]   ;;  %s2430_s0 = inlined_call_operand.vmem [shape: bf16[512,36], index: 0, kind: input, shape index: {}]   ;;  %s2431_s2 = inlined_call_operand.vmem [shape: f32[1,128], index: 2, kind: input, shape index: {}]   ;;  %s2432_s3 = inlined_call_operand.vmem [shape: bf16[512,128], index: 3, kind: output, shape index: {}]  }
   0x1   :  { %v2063_v0 = vld [vmem:[%s2429_s1] sm:$0xff]   ;;  %v2064_v1 = vld [vmem:[%s2429_s1 + $0x8] sm:$0xff]   ;;  %v2065_v2 = vld [vmem:[%s2429_s1 + $0x10] ss:$0 sps:$4 sm:$0x33]  }
   0x2   :  { %1985 = vmatprep.subr.bf16.mxu0 %v2063_v0  ;;  %2055 = vmatprep.subr.bf16.mxu1 %v2063_v0  ;;  %v2066_v3 = vld [vmem:[%s2430_s0] sm:$0xff]   ;;  %v490_v5 = vsel %vm488_vm1, %v2065_v2, 0  ;;  %v2068_v6 = vld [vmem:[%s2430_s0 + $0x8] sm:$0xff]   ;;  %v2070_v8 = vld [vmem:[%s2430_s0 + $0x10] sm:$0xff]  }
   0x3   :  { %1986 = vmatpush3.bf16.msra.mxu0 %v2063_v0  ;;  %2058 = vmatpush3.bf16.msra.mxu1 %v2063_v0  ;;  %v2067_v4 = vld [vmem:[%s2430_s0 + $0x80] sm:$0xff]   ;;  %v2069_v7 = vld [vmem:[%s2430_s0 + $0x88] sm:$0xff]   ;;  %v2071_v9 = vld [vmem:[%s2430_s0 + $0x90] sm:$0xff]  }
   0x4   :  { %1987 = vmatprep.subr.bf16.mxu0 %v2064_v1  ;;  %2056 = vmatprep.subr.bf16.mxu1 %v2064_v1  ;;  %v2072_v10 = vld [vmem:[%s2430_s0 + $0x18] sm:$0xff]   ;;  %v2074_v12 = vld [vmem:[%s2430_s0 + $0x20] sm:$0xff]   ;;  %v2076_v14 = vld [vmem:[%s2430_s0 + $0x28] sm:$0xff]  }
   0x5   :  { %1991 = vmatprep.mubr.msk.bf16.mxu0 %vm391_vm0, %v2066_v3  ;;  %2023 = vmatprep.mubr.msk.bf16.mxu1 %vm391_vm0, %v2067_v4  ;;  %v2073_v11 = vld [vmem:[%s2430_s0 + $0x98] sm:$0xff]   ;;  %v2075_v13 = vld [vmem:[%s2430_s0 + $0xa0] sm:$0xff]   ;;  %v2077_v15 = vld [vmem:[%s2430_s0 + $0xa8] sm:$0xff]  }
   0x6   :  { %v2078_v16 = vld [vmem:[%s2430_s0 + $0x30] sm:$0xff]   ;;  %v2080_v18 = vld [vmem:[%s2430_s0 + $0x38] sm:$0xff]   ;;  %v2082_v20 = vld [vmem:[%s2430_s0 + $0x40] sm:$0xff]  }
   0x7   :  { %1988 = vmatpush3.bf16.msra.mxu0 %v2064_v1  ;;  %2059 = vmatpush3.bf16.msra.mxu1 %v2064_v1  ;;  %v2079_v17 = vld [vmem:[%s2430_s0 + $0xb0] sm:$0xff]   ;;  %v2081_v19 = vld [vmem:[%s2430_s0 + $0xb8] sm:$0xff]   ;;  %v2083_v21 = vld [vmem:[%s2430_s0 + $0xc0] sm:$0xff]  }
   0x8   :  { %2061 = vmatprep.subr.msk.bf16.mxu0 %vm488_vm1, %v2065_v2  ;;  %2062 = vmatprep.subr.msk.bf16.mxu1 %vm488_vm1, %v2065_v2  ;;  %v2084_v22 = vld [vmem:[%s2430_s0 + $0x48] sm:$0xff]   ;;  %v2086_v24 = vld [vmem:[%s2430_s0 + $0x50] sm:$0xff]   ;;  %v2088_v26 = vld [vmem:[%s2430_s0 + $0x58] sm:$0xff]  }
   0x9   :  { %v2085_v23 = vld [vmem:[%s2430_s0 + $0xc8] sm:$0xff]   ;;  %v2087_v25 = vld [vmem:[%s2430_s0 + $0xd0] sm:$0xff]   ;;  %v2089_v27 = vld [vmem:[%s2430_s0 + $0xd8] sm:$0xff]  }
   0xa   :  { %v2090_v28 = vld [vmem:[%s2430_s0 + $0x60] sm:$0xff]   ;;  %v2092_v30 = vld [vmem:[%s2430_s0 + $0x68] sm:$0xff]   ;;  %v2094_v32 = vld [vmem:[%s2430_s0 + $0x70] sm:$0xff]  }
   0xb   :  { %1990 = vmatpush3.bf16.msra.mxu0 %v490_v5  ;;  %2060 = vmatpush3.bf16.msra.mxu1 %v490_v5  ;;  %v2091_v29 = vld [vmem:[%s2430_s0 + $0xe0] sm:$0xff]   ;;  %v2093_v31 = vld [vmem:[%s2430_s0 + $0xe8] sm:$0xff]   ;;  %v2095_v33 = vld [vmem:[%s2430_s0 + $0xf0] sm:$0xff]  }
   0xc   :  { %v2096_v34 = vld [vmem:[%s2430_s0 + $0x78] sm:$0xff]   ;;  %v2258_v36 = vld [vmem:[%s2431_s2] ss:$0 sm:$0xff] }
   0xd   :  { %v2097_v35 = vld [vmem:[%s2430_s0 + $0xf8] sm:$0xff]  }
   0xe   :  { %1992 = vmatmul.mubr.msk.bf16.vlgmr.msra.gmra.mrb[0].mxu0 %vm391_vm0, %v2068_v6  ;;  %2024 = vmatmul.mubr.msk.bf16.vlgmr.msra.gmra.mrb[0].mxu1 %vm391_vm0, %v2069_v7 }
   0xf   :  { %1995 = vmatprep.mubr.msk.bf16.mxu0 %vm391_vm0, %v2070_v8  ;;  %2027 = vmatprep.mubr.msk.bf16.mxu1 %vm391_vm0, %v2071_v9 }
  0x16   :  { %1996 = vmatmul.mubr.msk.bf16.gmra.mrb[4].mxu0 %vm391_vm0, %v2072_v10  ;;  %2028 = vmatmul.mubr.msk.bf16.gmra.mrb[4].mxu1 %vm391_vm0, %v2073_v11 }
  0x17   :  { %1999 = vmatprep.mubr.msk.bf16.mxu0 %vm391_vm0, %v2074_v12  ;;  %2031 = vmatprep.mubr.msk.bf16.mxu1 %vm391_vm0, %v2075_v13 }
  0x1e   :  { %2000 = vmatmul.mubr.msk.bf16.gmra.mrb[8].mxu0 %vm391_vm0, %v2076_v14  ;;  %2032 = vmatmul.mubr.msk.bf16.gmra.mrb[8].mxu1 %vm391_vm0, %v2077_v15 }
  0x1f   :  { %2003 = vmatprep.mubr.msk.bf16.mxu0 %vm391_vm0, %v2078_v16  ;;  %2035 = vmatprep.mubr.msk.bf16.mxu1 %vm391_vm0, %v2079_v17 }
  0x26   :  { %2004 = vmatmul.mubr.msk.bf16.gmra.mrb[12].mxu0 %vm391_vm0, %v2080_v18  ;;  %2036 = vmatmul.mubr.msk.bf16.gmra.mrb[12].mxu1 %vm391_vm0, %v2081_v19 }
  0x27   :  { %2007 = vmatprep.mubr.msk.bf16.mxu0 %vm391_vm0, %v2082_v20  ;;  %2039 = vmatprep.mubr.msk.bf16.mxu1 %vm391_vm0, %v2083_v21 }
  0x2e   :  { %2008 = vmatmul.mubr.msk.bf16.gmra.mrb[16].mxu0 %vm391_vm0, %v2084_v22  ;;  %2040 = vmatmul.mubr.msk.bf16.gmra.mrb[16].mxu1 %vm391_vm0, %v2085_v23 }
  0x2f   :  { %2011 = vmatprep.mubr.msk.bf16.mxu0 %vm391_vm0, %v2086_v24  ;;  %2043 = vmatprep.mubr.msk.bf16.mxu1 %vm391_vm0, %v2087_v25 }
  0x36   :  { %2012 = vmatmul.mubr.msk.bf16.gmra.mrb[20].mxu0 %vm391_vm0, %v2088_v26  ;;  %2044 = vmatmul.mubr.msk.bf16.gmra.mrb[20].mxu1 %vm391_vm0, %v2089_v27 }
  0x37   :  { %2015 = vmatprep.mubr.msk.bf16.mxu0 %vm391_vm0, %v2090_v28  ;;  %2047 = vmatprep.mubr.msk.bf16.mxu1 %vm391_vm0, %v2091_v29 }
  0x3e   :  { %2016 = vmatmul.mubr.msk.bf16.gmra.mrb[24].mxu0 %vm391_vm0, %v2092_v30  ;;  %2048 = vmatmul.mubr.msk.bf16.gmra.mrb[24].mxu1 %vm391_vm0, %v2093_v31 }
  0x3f   :  { %2019 = vmatprep.mubr.msk.bf16.mxu0 %vm391_vm0, %v2094_v32  ;;  %2051 = vmatprep.mubr.msk.bf16.mxu1 %vm391_vm0, %v2095_v33 }
  0x46   :  { %2020 = vmatmul.mubr.msk.bf16.gmra.mrb[28].mxu0 %vm391_vm0, %v2096_v34  ;;  %2052 = vmatmul.mubr.msk.bf16.gmra.mrb[28].mxu1 %vm391_vm0, %v2097_v35 }
  0xe1   :  { %v1993_v37 = vpop.f32.mrb[0].mxu0  ;;  %v2025_v38 = vpop.f32.mrb[0].mxu1 }
  0xe2   :  { %v985_v39 = vadd.f32 %v1993_v37, %v2258_v36  ;;  %v1017_v40 = vadd.f32 %v2025_v38, %v2258_v36  ;;  %v526_v41 = vpop.f32.mrb[1].mxu0  ;;  %v654_v42 = vpop.f32.mrb[1].mxu1 }
  0xe3   :  { %v983_v43 = vadd.f32 %v2258_v36, %v526_v41  ;;  %v1015_v44 = vadd.f32 %v2258_v36, %v654_v42  ;;  %v1994_v45 = vpop.f32.mrb[2].mxu0  ;;  %v2026_v46 = vpop.f32.mrb[2].mxu1 }
  0xe4   :  { %vm1049_vm2 = vcmp.ge.f32.partialorder %v985_v39, 0.0  ;;  %v1113_v47 = vmul.f32 0.2, %v985_v39  ;;  %vm1081_vm3 = vcmp.ge.f32.partialorder %v1017_v40, 0.0  ;;  %v1145_v48 = vmul.f32 0.2, %v1017_v40 }
  0xe5   :  { %vm1047_vm4 = vcmp.ge.f32.partialorder %v983_v43, 0.0  ;;  %v1111_v49 = vmul.f32 0.2, %v983_v43  ;;  %vm1079_vm5 = vcmp.ge.f32.partialorder %v1015_v44, 0.0  ;;  %v1143_v50 = vmul.f32 0.2, %v1015_v44 }
  0xe6   :  { %v986_v51 = vadd.f32 %v1994_v45, %v2258_v36  ;;  %v1018_v52 = vadd.f32 %v2026_v46, %v2258_v36  ;;  %v529_v53 = vpop.f32.mrb[3].mxu0  ;;  %v657_v54 = vpop.f32.mrb[3].mxu1  ;;  %v1177_v55 = vsel %vm1049_vm2, %v985_v39, %v1113_v47  ;;  %v1209_v56 = vsel %vm1081_vm3, %v1017_v40, %v1145_v48 }
  0xe7   :  { %v984_v57 = vadd.f32 %v2258_v36, %v529_v53  ;;  %v1016_v58 = vadd.f32 %v2258_v36, %v657_v54  ;;  %v1175_v63 = vsel %vm1047_vm4, %v983_v43, %v1111_v49  ;;  %v1207_v0 = vsel %vm1079_vm5, %v1015_v44, %v1143_v50 }
  0xe8   :  { %vm1050_vm6 = vcmp.ge.f32.partialorder %v986_v51, 0.0  ;;  %v1114_v59 = vmul.f32 0.2, %v986_v51  ;;  %vm1082_vm7 = vcmp.ge.f32.partialorder %v1018_v52, 0.0  ;;  %v1146_v60 = vmul.f32 0.2, %v1018_v52 }
  0xe9   :  { %vm1048_vm8 = vcmp.ge.f32.partialorder %v984_v57, 0.0  ;;  %v1112_v61 = vmul.f32 0.2, %v984_v57  ;;  %vm1080_vm9 = vcmp.ge.f32.partialorder %v1016_v58, 0.0  ;;  %v1144_v62 = vmul.f32 0.2, %v1016_v58 }
  0xea   :  { %v1178_v1 = vsel %vm1050_vm6, %v986_v51, %v1114_v59  ;;  %v1210_v2 = vsel %vm1082_vm7, %v1018_v52, %v1146_v60  ;;  %v1997_v3 = vpop.f32.mrb[4].mxu0  ;;  %v2029_v4 = vpop.f32.mrb[4].mxu1 }
  0xeb   :  { %v1767_v5 = vpack.c.bf16 %v1178_v1, %v1177_v55  ;;  %v1847_v6 = vpack.c.bf16 %v1210_v2, %v1209_v56  ;;  %v1176_v7 = vsel %vm1048_vm8, %v984_v57, %v1112_v61  ;;  %v1208_v8 = vsel %vm1080_vm9, %v1016_v58, %v1144_v62  ;;  %v542_v9 = vpop.f32.mrb[5].mxu0  ;;  %v670_v10 = vpop.f32.mrb[5].mxu1 }
  0xec   :  { %v1762_v11 = vpack.c.bf16 %v1176_v7, %v1175_v63  ;;  %v1842_v12 = vpack.c.bf16 %v1208_v8, %v1207_v0  ;;  %v989_v13 = vadd.f32 %v1997_v3, %v2258_v36  ;;  %v1021_v14 = vadd.f32 %v2029_v4, %v2258_v36  ;;  %v1998_v15 = vpop.f32.mrb[6].mxu0  ;;  %v2030_v16 = vpop.f32.mrb[6].mxu1 }
  0xed   :  { %1919 = vst [vmem:[%s2432_s3 + $0x8] sm:$0xff] %v1767_v5   ;;  %1935 = vst [vmem:[%s2432_s3 + $0x88] sm:$0xff] %v1847_v6   ;;  %v987_v17 = vadd.f32 %v2258_v36, %v542_v9  ;;  %v1019_v18 = vadd.f32 %v2258_v36, %v670_v10  ;;  %v990_v19 = vadd.f32 %v1998_v15, %v2258_v36  ;;  %v545_v21 = vpop.f32.mrb[7].mxu0  ;;  %v673_v22 = vpop.f32.mrb[7].mxu1 }
  0xee   :  { %v1022_v20 = vadd.f32 %v2030_v16, %v2258_v36  ;;  %1763 = vst [vmem:[%s2432_s3] sm:$0xff] %v1762_v11   ;;  %1934 = vst [vmem:[%s2432_s3 + $0x80] sm:$0xff] %v1842_v12   ;;  %vm1053_vm10 = vcmp.ge.f32.partialorder %v989_v13, 0.0  ;;  %v1117_v23 = vmul.f32 0.2, %v989_v13  ;;  %vm1085_vm11 = vcmp.ge.f32.partialorder %v1021_v14, 0.0 }
  0xef   :  { %v1149_v24 = vmul.f32 0.2, %v1021_v14  ;;  %vm1051_vm12 = vcmp.ge.f32.partialorder %v987_v17, 0.0  ;;  %v1115_v25 = vmul.f32 0.2, %v987_v17  ;;  %vm1083_vm13 = vcmp.ge.f32.partialorder %v1019_v18, 0.0 }
  0xf0   :  { %v1147_v26 = vmul.f32 0.2, %v1019_v18  ;;  %v1181_v27 = vsel %vm1053_vm10, %v989_v13, %v1117_v23  ;;  %vm1054_vm14 = vcmp.ge.f32.partialorder %v990_v19, 0.0  ;;  %v1118_v29 = vmul.f32 0.2, %v990_v19 }
  0xf1   :  { %v1213_v28 = vsel %vm1085_vm11, %v1021_v14, %v1149_v24  ;;  %v1179_v30 = vsel %vm1051_vm12, %v987_v17, %v1115_v25  ;;  %vm1086_vm15 = vcmp.ge.f32.partialorder %v1022_v20, 0.0  ;;  %v1150_v32 = vmul.f32 0.2, %v1022_v20  ;;  %v2001_v33 = vpop.f32.mrb[8].mxu0  ;;  %v2033_v34 = vpop.f32.mrb[8].mxu1 }
  0xf2   :  { %v1211_v31 = vsel %vm1083_vm13, %v1019_v18, %v1147_v26  ;;  %v1182_v35 = vsel %vm1054_vm14, %v990_v19, %v1118_v29  ;;  %v988_v37 = vadd.f32 %v2258_v36, %v545_v21  ;;  %v1020_v38 = vadd.f32 %v2258_v36, %v673_v22  ;;  %v558_v40 = vpop.f32.mrb[9].mxu0  ;;  %v686_v41 = vpop.f32.mrb[9].mxu1 }
  0xf3   :  { %v993_v39 = vadd.f32 %v2001_v33, %v2258_v36  ;;  %v1777_v42 = vpack.c.bf16 %v1182_v35, %v1181_v27  ;;  %v1214_v43 = vsel %vm1086_vm15, %v1022_v20, %v1150_v32  ;;  %v1025_v44 = vadd.f32 %v2033_v34, %v2258_v36  ;;  %v2002_v46 = vpop.f32.mrb[10].mxu0  ;;  %v2034_v47 = vpop.f32.mrb[10].mxu1 }
  0xf4   :  { %v991_v45 = vadd.f32 %v2258_v36, %v558_v40  ;;  %v1857_v48 = vpack.c.bf16 %v1214_v43, %v1213_v28  ;;  %vm1052_vm0 = vcmp.ge.f32.partialorder %v988_v37, 0.0  ;;  %v1116_v49 = vmul.f32 0.2, %v988_v37  ;;  %v561_v50 = vpop.f32.mrb[11].mxu0  ;;  %v689_v51 = vpop.f32.mrb[11].mxu1 }
  0xf5   :  { %vm1084_vm1 = vcmp.ge.f32.partialorder %v1020_v38, 0.0  ;;  %1921 = vst [vmem:[%s2432_s3 + $0x18] sm:$0xff] %v1777_v42   ;;  %v1148_v52 = vmul.f32 0.2, %v1020_v38  ;;  %vm1057_vm2 = vcmp.ge.f32.partialorder %v993_v39, 0.0  ;;  %vm1089_vm3 = vcmp.ge.f32.partialorder %v1025_v44, 0.0 }
  0xf6   :  { %v1121_v53 = vmul.f32 0.2, %v993_v39  ;;  %1937 = vst [vmem:[%s2432_s3 + $0x98] sm:$0xff] %v1857_v48   ;;  %v1180_v54 = vsel %vm1052_vm0, %v988_v37, %v1116_v49  ;;  %v1153_v55 = vmul.f32 0.2, %v1025_v44  ;;  %vm1055_vm4 = vcmp.ge.f32.partialorder %v991_v45, 0.0 }
  0xf7   :  { %v1119_v56 = vmul.f32 0.2, %v991_v45  ;;  %v1772_v57 = vpack.c.bf16 %v1180_v54, %v1179_v30  ;;  %v1212_v58 = vsel %vm1084_vm1, %v1020_v38, %v1148_v52  ;;  %v1023_v60 = vadd.f32 %v2258_v36, %v686_v41 }
  0xf8   :  { %v1185_v59 = vsel %vm1057_vm2, %v993_v39, %v1121_v53  ;;  %v1852_v61 = vpack.c.bf16 %v1212_v58, %v1211_v31  ;;  %v1217_v62 = vsel %vm1089_vm3, %v1025_v44, %v1153_v55  ;;  %v994_v0 = vadd.f32 %v2002_v46, %v2258_v36 }
  0xf9   :  { %v1183_v63 = vsel %vm1055_vm4, %v991_v45, %v1119_v56  ;;  %1920 = vst [vmem:[%s2432_s3 + $0x10] sm:$0xff] %v1772_v57   ;;  %vm1087_vm5 = vcmp.ge.f32.partialorder %v1023_v60, 0.0  ;;  %v1151_v1 = vmul.f32 0.2, %v1023_v60  ;;  %v1026_v2 = vadd.f32 %v2034_v47, %v2258_v36  ;;  %v2005_v4 = vpop.f32.mrb[12].mxu0  ;;  %v2037_v5 = vpop.f32.mrb[12].mxu1 }
  0xfa   :  { %v992_v3 = vadd.f32 %v2258_v36, %v561_v50  ;;  %1936 = vst [vmem:[%s2432_s3 + $0x90] sm:$0xff] %v1852_v61   ;;  %vm1058_vm6 = vcmp.ge.f32.partialorder %v994_v0, 0.0  ;;  %v1122_v6 = vmul.f32 0.2, %v994_v0  ;;  %v1024_v7 = vadd.f32 %v2258_v36, %v689_v51  ;;  %v574_v9 = vpop.f32.mrb[13].mxu0  ;;  %v702_v10 = vpop.f32.mrb[13].mxu1 }
  0xfb   :  { %v997_v8 = vadd.f32 %v2005_v4, %v2258_v36  ;;  %v1215_v11 = vsel %vm1087_vm5, %v1023_v60, %v1151_v1  ;;  %vm1090_vm7 = vcmp.ge.f32.partialorder %v1026_v2, 0.0  ;;  %v1154_v12 = vmul.f32 0.2, %v1026_v2  ;;  %v2006_v13 = vpop.f32.mrb[14].mxu0  ;;  %v2038_v14 = vpop.f32.mrb[14].mxu1 }
  0xfc   :  { %vm1056_vm8 = vcmp.ge.f32.partialorder %v992_v3, 0.0  ;;  %v1186_v15 = vsel %vm1058_vm6, %v994_v0, %v1122_v6  ;;  %v1120_v16 = vmul.f32 0.2, %v992_v3  ;;  %vm1088_vm9 = vcmp.ge.f32.partialorder %v1024_v7, 0.0  ;;  %v577_v18 = vpop.f32.mrb[15].mxu0  ;;  %v705_v22 = vpop.f32.mrb[15].mxu1 }
  0xfd   :  { %v1152_v17 = vmul.f32 0.2, %v1024_v7  ;;  %v1787_v19 = vpack.c.bf16 %v1186_v15, %v1185_v59  ;;  %v1218_v20 = vsel %vm1090_vm7, %v1026_v2, %v1154_v12  ;;  %vm1061_vm10 = vcmp.ge.f32.partialorder %v997_v8, 0.0 }
  0xfe   :  { %v1125_v21 = vmul.f32 0.2, %v997_v8  ;;  %v1867_v23 = vpack.c.bf16 %v1218_v20, %v1217_v62  ;;  %v1184_v24 = vsel %vm1056_vm8, %v992_v3, %v1120_v16  ;;  %v1029_v26 = vadd.f32 %v2037_v5, %v2258_v36 }
  0xff   :  { %v1216_v25 = vsel %vm1088_vm9, %v1024_v7, %v1152_v17  ;;  %1923 = vst [vmem:[%s2432_s3 + $0x28] sm:$0xff] %v1787_v19   ;;  %v1782_v27 = vpack.c.bf16 %v1184_v24, %v1183_v63  ;;  %v995_v30 = vadd.f32 %v2258_v36, %v574_v9  ;;  %v1027_v32 = vadd.f32 %v2258_v36, %v702_v10 }
 0x100   :  { %v1862_v28 = vpack.c.bf16 %v1216_v25, %v1215_v11  ;;  %v1189_v29 = vsel %vm1061_vm10, %v997_v8, %v1125_v21  ;;  %1939 = vst [vmem:[%s2432_s3 + $0xa8] sm:$0xff] %v1867_v23   ;;  %vm1093_vm11 = vcmp.ge.f32.partialorder %v1029_v26, 0.0  ;;  %v1157_v31 = vmul.f32 0.2, %v1029_v26 }
 0x101   :  { %v998_v33 = vadd.f32 %v2006_v13, %v2258_v36  ;;  %1922 = vst [vmem:[%s2432_s3 + $0x20] sm:$0xff] %v1782_v27   ;;  %vm1059_vm12 = vcmp.ge.f32.partialorder %v995_v30, 0.0  ;;  %v1123_v34 = vmul.f32 0.2, %v995_v30  ;;  %v1030_v35 = vadd.f32 %v2038_v14, %v2258_v36  ;;  %v2009_v38 = vpop.f32.mrb[16].mxu0  ;;  %v2041_v39 = vpop.f32.mrb[16].mxu1 }
 0x102   :  { %1938 = vst [vmem:[%s2432_s3 + $0xa0] sm:$0xff] %v1862_v28   ;;  %v996_v37 = vadd.f32 %v2258_v36, %v577_v18  ;;  %v1221_v40 = vsel %vm1093_vm11, %v1029_v26, %v1157_v31  ;;  %vm1091_vm13 = vcmp.ge.f32.partialorder %v1027_v32, 0.0  ;;  %v1155_v41 = vmul.f32 0.2, %v1027_v32  ;;  %v590_v42 = vpop.f32.mrb[17].mxu0  ;;  %v718_v43 = vpop.f32.mrb[17].mxu1 }
 0x103   :  { %vm1062_vm14 = vcmp.ge.f32.partialorder %v998_v33, 0.0  ;;  %v1187_v44 = vsel %vm1059_vm12, %v995_v30, %v1123_v34  ;;  %v1126_v45 = vmul.f32 0.2, %v998_v33  ;;  %vm1094_vm15 = vcmp.ge.f32.partialorder %v1030_v35, 0.0  ;;  %v2010_v47 = vpop.f32.mrb[18].mxu0  ;;  %v2042_v51 = vpop.f32.mrb[18].mxu1 }
 0x104   :  { %v1158_v46 = vmul.f32 0.2, %v1030_v35  ;;  %v1219_v48 = vsel %vm1091_vm13, %v1027_v32, %v1155_v41  ;;  %vm1060_vm0 = vcmp.ge.f32.partialorder %v996_v37, 0.0  ;;  %v1124_v49 = vmul.f32 0.2, %v996_v37  ;;  %v593_v52 = vpop.f32.mrb[19].mxu0 }
 0x105   :  { %v1028_v50 = vadd.f32 %v2258_v36, %v705_v22  ;;  %v1190_v53 = vsel %vm1062_vm14, %v998_v33, %v1126_v45  ;;  %v1001_v55 = vadd.f32 %v2009_v38, %v2258_v36  ;;  %v1033_v56 = vadd.f32 %v2041_v39, %v2258_v36  ;;  %v721_v57 = vpop.f32.mrb[19].mxu1 }
 0x106   :  { %v1222_v54 = vsel %vm1094_vm15, %v1030_v35, %v1158_v46  ;;  %v1797_v58 = vpack.c.bf16 %v1190_v53, %v1189_v29  ;;  %v1188_v60 = vsel %vm1060_vm0, %v996_v37, %v1124_v49  ;;  %v999_v1 = vadd.f32 %v2258_v36, %v590_v42 }
 0x107   :  { %v1877_v59 = vpack.c.bf16 %v1222_v54, %v1221_v40  ;;  %vm1092_vm1 = vcmp.ge.f32.partialorder %v1028_v50, 0.0  ;;  %v1792_v61 = vpack.c.bf16 %v1188_v60, %v1187_v44  ;;  %v1156_v62 = vmul.f32 0.2, %v1028_v50 }
 0x108   :  { %vm1065_vm2 = vcmp.ge.f32.partialorder %v1001_v55, 0.0  ;;  %v1129_v63 = vmul.f32 0.2, %v1001_v55  ;;  %1925 = vst [vmem:[%s2432_s3 + $0x38] sm:$0xff] %v1797_v58   ;;  %vm1097_vm3 = vcmp.ge.f32.partialorder %v1033_v56, 0.0  ;;  %v1031_v2 = vadd.f32 %v2258_v36, %v718_v43 }
 0x109   :  { %1941 = vst [vmem:[%s2432_s3 + $0xb8] sm:$0xff] %v1877_v59   ;;  %v1161_v0 = vmul.f32 0.2, %v1033_v56  ;;  %1924 = vst [vmem:[%s2432_s3 + $0x30] sm:$0xff] %v1792_v61   ;;  %v1220_v3 = vsel %vm1092_vm1, %v1028_v50, %v1156_v62  ;;  %v1002_v5 = vadd.f32 %v2010_v47, %v2258_v36  ;;  %v1034_v6 = vadd.f32 %v2042_v51, %v2258_v36  ;;  %v2013_v7 = vpop.f32.mrb[20].mxu0  ;;  %v2045_v8 = vpop.f32.mrb[20].mxu1 }
 0x10a   :  { %v1193_v4 = vsel %vm1065_vm2, %v1001_v55, %v1129_v63  ;;  %v1872_v9 = vpack.c.bf16 %v1220_v3, %v1219_v48  ;;  %vm1063_vm4 = vcmp.ge.f32.partialorder %v999_v1, 0.0  ;;  %v1127_v11 = vmul.f32 0.2, %v999_v1  ;;  %v606_v12 = vpop.f32.mrb[21].mxu0  ;;  %v734_v13 = vpop.f32.mrb[21].mxu1 }
 0x10b   :  { %v1225_v10 = vsel %vm1097_vm3, %v1033_v56, %v1161_v0  ;;  %vm1095_vm5 = vcmp.ge.f32.partialorder %v1031_v2, 0.0  ;;  %v1159_v14 = vmul.f32 0.2, %v1031_v2  ;;  %vm1066_vm6 = vcmp.ge.f32.partialorder %v1002_v5, 0.0  ;;  %v2014_v19 = vpop.f32.mrb[22].mxu0  ;;  %v2046_v20 = vpop.f32.mrb[22].mxu1 }
 0x10c   :  { %v1130_v15 = vmul.f32 0.2, %v1002_v5  ;;  %1940 = vst [vmem:[%s2432_s3 + $0xb0] sm:$0xff] %v1872_v9   ;;  %v1191_v16 = vsel %vm1063_vm4, %v999_v1, %v1127_v11  ;;  %vm1098_vm7 = vcmp.ge.f32.partialorder %v1034_v6, 0.0  ;;  %v1162_v17 = vmul.f32 0.2, %v1034_v6 }
 0x10d   :  { %v1000_v18 = vadd.f32 %v2258_v36, %v593_v52  ;;  %v1223_v21 = vsel %vm1095_vm5, %v1031_v2, %v1159_v14  ;;  %v1032_v23 = vadd.f32 %v2258_v36, %v721_v57  ;;  %v1005_v24 = vadd.f32 %v2013_v7, %v2258_v36  ;;  %v609_v25 = vpop.f32.mrb[23].mxu0  ;;  %v737_v26 = vpop.f32.mrb[23].mxu1 }
 0x10e   :  { %v1194_v22 = vsel %vm1066_vm6, %v1002_v5, %v1130_v15  ;;  %v1226_v28 = vsel %vm1098_vm7, %v1034_v6, %v1162_v17  ;;  %v1037_v34 = vadd.f32 %v2045_v8, %v2258_v36  ;;  %v1003_v35 = vadd.f32 %v2258_v36, %v606_v12 }
 0x10f   :  { %v1807_v27 = vpack.c.bf16 %v1194_v22, %v1193_v4  ;;  %vm1064_vm8 = vcmp.ge.f32.partialorder %v1000_v18, 0.0  ;;  %v1128_v29 = vmul.f32 0.2, %v1000_v18  ;;  %v1887_v30 = vpack.c.bf16 %v1226_v28, %v1225_v10 }
 0x110   :  { %vm1096_vm9 = vcmp.ge.f32.partialorder %v1032_v23, 0.0  ;;  %v1160_v31 = vmul.f32 0.2, %v1032_v23  ;;  %vm1069_vm10 = vcmp.ge.f32.partialorder %v1005_v24, 0.0  ;;  %v1133_v33 = vmul.f32 0.2, %v1005_v24 }
 0x111   :  { %1927 = vst [vmem:[%s2432_s3 + $0x48] sm:$0xff] %v1807_v27   ;;  %v1192_v32 = vsel %vm1064_vm8, %v1000_v18, %v1128_v29  ;;  %1943 = vst [vmem:[%s2432_s3 + $0xc8] sm:$0xff] %v1887_v30   ;;  %v1035_v39 = vadd.f32 %v2258_v36, %v734_v13  ;;  %v1006_v40 = vadd.f32 %v2014_v19, %v2258_v36  ;;  %v2017_v41 = vpop.f32.mrb[24].mxu0  ;;  %v2049_v42 = vpop.f32.mrb[24].mxu1  ;;  %vm1101_vm11 = vcmp.ge.f32.partialorder %v1037_v34, 0.0 }
 0x112   :  { %v1802_v37 = vpack.c.bf16 %v1192_v32, %v1191_v16  ;;  %v1224_v38 = vsel %vm1096_vm9, %v1032_v23, %v1160_v31  ;;  %v1165_v44 = vmul.f32 0.2, %v1037_v34  ;;  %v622_v45 = vpop.f32.mrb[25].mxu0  ;;  %v750_v46 = vpop.f32.mrb[25].mxu1  ;;  %v1197_v47 = vsel %vm1069_vm10, %v1005_v24, %v1133_v33 }
 0x113   :  { %v1882_v43 = vpack.c.bf16 %v1224_v38, %v1223_v21  ;;  %vm1067_vm12 = vcmp.ge.f32.partialorder %v1003_v35, 0.0  ;;  %v1131_v48 = vmul.f32 0.2, %v1003_v35  ;;  %v1163_v49 = vmul.f32 0.2, %v1035_v39  ;;  %v2018_v52 = vpop.f32.mrb[26].mxu0 }
 0x114   :  { %1926 = vst [vmem:[%s2432_s3 + $0x40] sm:$0xff] %v1802_v37   ;;  %vm1099_vm13 = vcmp.ge.f32.partialorder %v1035_v39, 0.0  ;;  %vm1070_vm14 = vcmp.ge.f32.partialorder %v1006_v40, 0.0  ;;  %v1134_v50 = vmul.f32 0.2, %v1006_v40  ;;  %v1038_v51 = vadd.f32 %v2046_v20, %v2258_v36  ;;  %v2050_v53 = vpop.f32.mrb[26].mxu1 }
 0x115   :  { %1942 = vst [vmem:[%s2432_s3 + $0xc0] sm:$0xff] %v1882_v43   ;;  %v1229_v54 = vsel %vm1101_vm11, %v1037_v34, %v1165_v44  ;;  %v1195_v55 = vsel %vm1067_vm12, %v1003_v35, %v1131_v48  ;;  %v1004_v56 = vadd.f32 %v2258_v36, %v609_v25  ;;  %v1036_v57 = vadd.f32 %v2258_v36, %v737_v26  ;;  %v625_v58 = vpop.f32.mrb[27].mxu0  ;;  %v753_v59 = vpop.f32.mrb[27].mxu1 }
 0x116   :  { %v1198_v60 = vsel %vm1070_vm14, %v1006_v40, %v1134_v50  ;;  %vm1102_vm15 = vcmp.ge.f32.partialorder %v1038_v51, 0.0  ;;  %v1166_v61 = vmul.f32 0.2, %v1038_v51  ;;  %v1009_v62 = vadd.f32 %v2017_v41, %v2258_v36 }
 0x117   :  { %v1817_v63 = vpack.c.bf16 %v1198_v60, %v1197_v47  ;;  %vm1068_vm0 = vcmp.ge.f32.partialorder %v1004_v56, 0.0  ;;  %v1132_v0 = vmul.f32 0.2, %v1004_v56  ;;  %vm1100_vm1 = vcmp.ge.f32.partialorder %v1036_v57, 0.0 }
 0x118   :  { %v1230_v1 = vsel %vm1102_vm15, %v1038_v51, %v1166_v61  ;;  %v1164_v2 = vmul.f32 0.2, %v1036_v57  ;;  %vm1073_vm2 = vcmp.ge.f32.partialorder %v1009_v62, 0.0  ;;  %v1137_v3 = vmul.f32 0.2, %v1009_v62 }
 0x119   :  { %1929 = vst [vmem:[%s2432_s3 + $0x58] sm:$0xff] %v1817_v63   ;;  %v1897_v4 = vpack.c.bf16 %v1230_v1, %v1229_v54  ;;  %v1196_v5 = vsel %vm1068_vm0, %v1004_v56, %v1132_v0  ;;  %v1041_v6 = vadd.f32 %v2049_v42, %v2258_v36  ;;  %v1007_v7 = vadd.f32 %v2258_v36, %v622_v45  ;;  %v2021_v8 = vpop.f32.mrb[28].mxu0  ;;  %v2053_v9 = vpop.f32.mrb[28].mxu1 }
 0x11a   :  { %v1227_v10 = vsel %vm1099_vm13, %v1035_v39, %v1163_v49  ;;  %v1812_v11 = vpack.c.bf16 %v1196_v5, %v1195_v55  ;;  %v1228_v12 = vsel %vm1100_vm1, %v1036_v57, %v1164_v2  ;;  %v1039_v13 = vadd.f32 %v2258_v36, %v750_v46  ;;  %v638_v14 = vpop.f32.mrb[29].mxu0  ;;  %v766_v15 = vpop.f32.mrb[29].mxu1 }
 0x11b   :  { %1945 = vst [vmem:[%s2432_s3 + $0xd8] sm:$0xff] %v1897_v4   ;;  %v1892_v16 = vpack.c.bf16 %v1228_v12, %v1227_v10  ;;  %vm1105_vm3 = vcmp.ge.f32.partialorder %v1041_v6, 0.0  ;;  %v1169_v17 = vmul.f32 0.2, %v1041_v6  ;;  %vm1071_vm4 = vcmp.ge.f32.partialorder %v1007_v7, 0.0  ;;  %v2022_v18 = vpop.f32.mrb[30].mxu0 }
 0x11c   :  { %v2054_v19 = vpop.f32.mrb[30].mxu1  ;;  %1928 = vst [vmem:[%s2432_s3 + $0x50] sm:$0xff] %v1812_v11   ;;  %v1201_v20 = vsel %vm1073_vm2, %v1009_v62, %v1137_v3  ;;  %v1135_v21 = vmul.f32 0.2, %v1007_v7  ;;  %vm1103_vm5 = vcmp.ge.f32.partialorder %v1039_v13, 0.0  ;;  %v1010_v22 = vadd.f32 %v2018_v52, %v2258_v36  ;;  %v641_v23 = vpop.f32.mrb[31].mxu0 }
 0x11d   :  { %1944 = vst [vmem:[%s2432_s3 + $0xd0] sm:$0xff] %v1892_v16   ;;  %v1167_v24 = vmul.f32 0.2, %v1039_v13  ;;  %v1042_v25 = vadd.f32 %v2050_v53, %v2258_v36  ;;  %v1008_v26 = vadd.f32 %v2258_v36, %v625_v58  ;;  %v1040_v27 = vadd.f32 %v2258_v36, %v753_v59  ;;  %v769_v28 = vpop.f32.mrb[31].mxu1 }
 0x11e   :  { %v1233_v29 = vsel %vm1105_vm3, %v1041_v6, %v1169_v17  ;;  %v1199_v30 = vsel %vm1071_vm4, %v1007_v7, %v1135_v21  ;;  %vm1074_vm6 = vcmp.ge.f32.partialorder %v1010_v22, 0.0  ;;  %v1138_v31 = vmul.f32 0.2, %v1010_v22 }
 0x11f   :  { %vm1106_vm7 = vcmp.ge.f32.partialorder %v1042_v25, 0.0  ;;  %v1170_v32 = vmul.f32 0.2, %v1042_v25  ;;  %vm1072_vm8 = vcmp.ge.f32.partialorder %v1008_v26, 0.0  ;;  %v1136_v33 = vmul.f32 0.2, %v1008_v26 }
 0x120   :  { %v1202_v34 = vsel %vm1074_vm6, %v1010_v22, %v1138_v31  ;;  %vm1104_vm9 = vcmp.ge.f32.partialorder %v1040_v27, 0.0  ;;  %v1168_v35 = vmul.f32 0.2, %v1040_v27  ;;  %v1013_v37 = vadd.f32 %v2021_v8, %v2258_v36 }
 0x121   :  { %v1827_v38 = vpack.c.bf16 %v1202_v34, %v1201_v20  ;;  %v1234_v39 = vsel %vm1106_vm7, %v1042_v25, %v1170_v32  ;;  %v1200_v40 = vsel %vm1072_vm8, %v1008_v26, %v1136_v33  ;;  %v1045_v41 = vadd.f32 %v2053_v9, %v2258_v36 }
 0x122   :  { %v1231_v42 = vsel %vm1103_vm5, %v1039_v13, %v1167_v24  ;;  %v1907_v43 = vpack.c.bf16 %v1234_v39, %v1233_v29  ;;  %v1822_v44 = vpack.c.bf16 %v1200_v40, %v1199_v30  ;;  %v1232_v45 = vsel %vm1104_vm9, %v1040_v27, %v1168_v35 }
 0x123   :  { %1931 = vst [vmem:[%s2432_s3 + $0x68] sm:$0xff] %v1827_v38   ;;  %v1902_v46 = vpack.c.bf16 %v1232_v45, %v1231_v42  ;;  %vm1077_vm10 = vcmp.ge.f32.partialorder %v1013_v37, 0.0  ;;  %v1141_v47 = vmul.f32 0.2, %v1013_v37  ;;  %v1173_v48 = vmul.f32 0.2, %v1045_v41 }
 0x124   :  { %1947 = vst [vmem:[%s2432_s3 + $0xe8] sm:$0xff] %v1907_v43   ;;  %1930 = vst [vmem:[%s2432_s3 + $0x60] sm:$0xff] %v1822_v44   ;;  %v1011_v49 = vadd.f32 %v2258_v36, %v638_v14  ;;  %v1043_v50 = vadd.f32 %v2258_v36, %v766_v15  ;;  %v1014_v51 = vadd.f32 %v2022_v18, %v2258_v36  ;;  %vm1109_vm11 = vcmp.ge.f32.partialorder %v1045_v41, 0.0 }
 0x125   :  { %v1046_v52 = vadd.f32 %v2054_v19, %v2258_v36  ;;  %1946 = vst [vmem:[%s2432_s3 + $0xe0] sm:$0xff] %v1902_v46   ;;  %v1012_v53 = vadd.f32 %v2258_v36, %v641_v23  ;;  %v1044_v54 = vadd.f32 %v2258_v36, %v769_v28  ;;  %v1205_v55 = vsel %vm1077_vm10, %v1013_v37, %v1141_v47 }
 0x126   :  { %vm1075_vm12 = vcmp.ge.f32.partialorder %v1011_v49, 0.0  ;;  %v1139_v56 = vmul.f32 0.2, %v1011_v49  ;;  %v1171_v57 = vmul.f32 0.2, %v1043_v50  ;;  %vm1078_vm13 = vcmp.ge.f32.partialorder %v1014_v51, 0.0 }
 0x127   :  { %v1142_v58 = vmul.f32 0.2, %v1014_v51  ;;  %vm1110_vm14 = vcmp.ge.f32.partialorder %v1046_v52, 0.0  ;;  %v1174_v59 = vmul.f32 0.2, %v1046_v52  ;;  %v1237_v60 = vsel %vm1109_vm11, %v1045_v41, %v1173_v48 }
 0x128   :  { %vm1107_vm15 = vcmp.ge.f32.partialorder %v1043_v50, 0.0  ;;  %vm1076_vm0 = vcmp.ge.f32.partialorder %v1012_v53, 0.0  ;;  %v1140_v61 = vmul.f32 0.2, %v1012_v53  ;;  %vm1108_vm1 = vcmp.ge.f32.partialorder %v1044_v54, 0.0 }
 0x129   :  { %v1206_v62 = vsel %vm1078_vm13, %v1014_v51, %v1142_v58  ;;  %v1238_v63 = vsel %vm1110_vm14, %v1046_v52, %v1174_v59  ;;  %v1172_v0 = vmul.f32 0.2, %v1044_v54  ;;  %v1203_v1 = vsel %vm1075_vm12, %v1011_v49, %v1139_v56 }
 0x12a   :  { %v1837_v2 = vpack.c.bf16 %v1206_v62, %v1205_v55  ;;  %v1917_v3 = vpack.c.bf16 %v1238_v63, %v1237_v60  ;;  %v1204_v36 = vsel %vm1076_vm0, %v1012_v53, %v1140_v61  ;;  %v1235_v4 = vsel %vm1107_vm15, %v1043_v50, %v1171_v57 }
 0x12b   :  { %v1832_v5 = vpack.c.bf16 %v1204_v36, %v1203_v1  ;;  %v1236_v6 = vsel %vm1108_vm1, %v1044_v54, %v1172_v0 }
 0x12c   :  { %1933 = vst [vmem:[%s2432_s3 + $0x78] sm:$0xff] %v1837_v2   ;;  %1949 = vst [vmem:[%s2432_s3 + $0xf8] sm:$0xff] %v1917_v3   ;;  %v1912_v7 = vpack.c.bf16 %v1236_v6, %v1235_v4 }
 0x12d   :  { %1932 = vst [vmem:[%s2432_s3 + $0x70] sm:$0xff] %v1832_v5  }
 0x12e   :  { %1948 = vst [vmem:[%s2432_s3 + $0xf0] sm:$0xff] %v1912_v7  }

// kernel: resblock_forward.4
= control target key start
LH: loop header
LB: loop body
LE: loop exit
PB: predicated region body
PF: predicated region fallthrough
CT: control target
= control target key end

     0   :  { %v561_v0 = vmov 0   ;;  %vm211_vm0 = vcmask 130048   ;;  %s734_s1 = inlined_call_operand.vmem [shape: bf16[144,128], index: 1, kind: input, shape index: {}]   ;;  %s735_s0 = inlined_call_operand.vmem [shape: bf16[128,144], index: 0, kind: input, shape index: {}]   ;;  %s736_s2 = inlined_call_operand.vmem [shape: f32[1,128], index: 2, kind: input, shape index: {}]   ;;  %s737_s3 = inlined_call_operand.vmem [shape: f32[128,128], index: 3, kind: output, shape index: {}]  }
   0x1   :  { %236 = vmatprep.subr.bf16.mxu0 %v561_v0  ;;  %509 = vmatprep.subr.bf16.mxu1 %v561_v0  ;;  %v528_v1 = vld [vmem:[%s734_s1] sm:$0xff]   ;;  %v529_v2 = vld [vmem:[%s734_s1 + $0x8] sm:$0xff]   ;;  %v530_v3 = vld [vmem:[%s734_s1 + $0x10] sm:$0xff]  }
   0x2   :  { %237 = vmatpush1.bf16.msra.mxu0 %v528_v1  ;;  %518 = vmatpush1.bf16.msra.mxu1 %v528_v1  ;;  %v531_v4 = vld [vmem:[%s734_s1 + $0x18] sm:$0xff]   ;;  %v539_v5 = vld [vmem:[%s735_s0 + $0x4] ss:$8 sps:$4 sm:$0xff]   ;;  %v534_v9 = vld [vmem:[%s734_s1 + $0x30] sm:$0xff]  }
   0x3   :  { %238 = vmatprep.subr.bf16.mxu0 %v561_v0  ;;  %510 = vmatprep.subr.bf16.mxu1 %v561_v0  ;;  %v542_v6 = vld [vmem:[%s735_s0 + $0x44] ss:$8 sps:$4 sm:$0xff]   ;;  %v535_v10 = vld [vmem:[%s734_s1 + $0x38] sm:$0xff]   ;;  %v537_v12 = vld [vmem:[%s735_s0] ss:$8 sps:$4 sm:$0xff]  }
   0x4   :  { %500 = vmatprep.mubr.msk.bf16.mxu0 %vm211_vm0, %v539_v5  ;;  %504 = vmatprep.mubr.msk.bf16.mxu1 %vm211_vm0, %v542_v6  ;;  %v532_v7 = vld [vmem:[%s734_s1 + $0x20] sm:$0xff]   ;;  %v533_v8 = vld [vmem:[%s734_s1 + $0x28] sm:$0xff]   ;;  %v543_v14 = vld [vmem:[%s735_s0 + $0x14] ss:$8 sps:$4 sm:$0xff]  }
   0x5   :  { %v536_v11 = vld [vmem:[%s734_s1 + $0x40] sm:$0xff]   ;;  %v545_v15 = vld [vmem:[%s735_s0 + $0x54] ss:$8 sps:$4 sm:$0xff]   ;;  %v547_v16 = vld [vmem:[%s735_s0 + $0x10] ss:$8 sps:$4 sm:$0xff]  }
   0x6   :  { %239 = vmatpush1.bf16.msra.mxu0 %v529_v2  ;;  %519 = vmatpush1.bf16.msra.mxu1 %v529_v2  ;;  %v540_v13 = vld [vmem:[%s735_s0 + $0x40] ss:$8 sps:$4 sm:$0xff]   ;;  %v548_v17 = vld [vmem:[%s735_s0 + $0x50] ss:$8 sps:$4 sm:$0xff]   ;;  %v549_v18 = vld [vmem:[%s735_s0 + $0x24] ss:$8 sps:$4 sm:$0xff]  }
   0x7   :  { %240 = vmatprep.subr.bf16.mxu0 %v561_v0  ;;  %511 = vmatprep.subr.bf16.mxu1 %v561_v0  ;;  %v551_v19 = vld [vmem:[%s735_s0 + $0x64] ss:$8 sps:$4 sm:$0xff]   ;;  %v553_v20 = vld [vmem:[%s735_s0 + $0x20] ss:$8 sps:$4 sm:$0xff]   ;;  %v555_v22 = vld [vmem:[%s735_s0 + $0x34] ss:$8 sps:$4 sm:$0xff]  }
   0x8   :  { %v554_v21 = vld [vmem:[%s735_s0 + $0x60] ss:$8 sps:$4 sm:$0xff]   ;;  %v557_v23 = vld [vmem:[%s735_s0 + $0x74] ss:$8 sps:$4 sm:$0xff]   ;;  %v559_v24 = vld [vmem:[%s735_s0 + $0x30] ss:$8 sps:$4 sm:$0xff]  }
   0x9   :  { %v560_v25 = vld [vmem:[%s735_s0 + $0x70] ss:$8 sps:$4 sm:$0xff]   ;;  %v668_v26 = vld [vmem:[%s736_s2] ss:$0 sm:$0xff] }
   0xa   :  { %241 = vmatpush1.bf16.msra.mxu0 %v530_v3  ;;  %520 = vmatpush1.bf16.msra.mxu1 %v530_v3 }
   0xb   :  { %242 = vmatprep.subr.bf16.mxu0 %v561_v0  ;;  %512 = vmatprep.subr.bf16.mxu1 %v561_v0 }
   0xe   :  { %243 = vmatpush1.bf16.msra.mxu0 %v531_v4  ;;  %521 = vmatpush1.bf16.msra.mxu1 %v531_v4 }
   0xf   :  { %244 = vmatprep.subr.bf16.mxu0 %v561_v0  ;;  %513 = vmatprep.subr.bf16.mxu1 %v561_v0 }
  0x12   :  { %245 = vmatpush1.bf16.msra.mxu0 %v532_v7  ;;  %522 = vmatpush1.bf16.msra.mxu1 %v532_v7 }
  0x13   :  { %246 = vmatprep.subr.bf16.mxu0 %v561_v0  ;;  %514 = vmatprep.subr.bf16.mxu1 %v561_v0 }
  0x16   :  { %247 = vmatpush1.bf16.msra.mxu0 %v533_v8  ;;  %523 = vmatpush1.bf16.msra.mxu1 %v533_v8 }
  0x17   :  { %248 = vmatprep.subr.bf16.mxu0 %v561_v0  ;;  %515 = vmatprep.subr.bf16.mxu1 %v561_v0 }
  0x1a   :  { %249 = vmatpush1.bf16.msra.mxu0 %v534_v9  ;;  %524 = vmatpush1.bf16.msra.mxu1 %v534_v9 }
  0x1b   :  { %250 = vmatprep.subr.bf16.mxu0 %v561_v0  ;;  %516 = vmatprep.subr.bf16.mxu1 %v561_v0 }
  0x1e   :  { %251 = vmatpush1.bf16.msra.mxu0 %v535_v10  ;;  %525 = vmatpush1.bf16.msra.mxu1 %v535_v10 }
  0x1f   :  { %252 = vmatprep.subr.bf16.mxu0 %v561_v0  ;;  %517 = vmatprep.subr.bf16.mxu1 %v561_v0 }
  0x22   :  { %253 = vmatpush1.bf16.msra.mxu0 %v536_v11  ;;  %526 = vmatpush1.bf16.msra.mxu1 %v536_v11 }
  0x25   :  { %269 = vmatmul.mubr.bf16.vlgmr.msra.gmra.mrb[0].mxu0 %v537_v12  ;;  %301 = vmatmul.mubr.bf16.vlgmr.msra.gmra.mrb[0].mxu1 %v540_v13 }
  0x26   :  { %501 = vmatprep.mubr.msk.bf16.mxu0 %vm211_vm0, %v543_v14  ;;  %505 = vmatprep.mubr.msk.bf16.mxu1 %vm211_vm0, %v545_v15 }
  0x2d   :  { %277 = vmatmul.mubr.bf16.gmra.mrb[4].mxu0 %v547_v16  ;;  %309 = vmatmul.mubr.bf16.gmra.mrb[4].mxu1 %v548_v17 }
  0x2e   :  { %502 = vmatprep.mubr.msk.bf16.mxu0 %vm211_vm0, %v549_v18  ;;  %506 = vmatprep.mubr.msk.bf16.mxu1 %vm211_vm0, %v551_v19 }
  0x35   :  { %285 = vmatmul.mubr.bf16.gmra.mrb[8].mxu0 %v553_v20  ;;  %317 = vmatmul.mubr.bf16.gmra.mrb[8].mxu1 %v554_v21 }
  0x36   :  { %503 = vmatprep.mubr.msk.bf16.mxu0 %vm211_vm0, %v555_v22  ;;  %507 = vmatprep.mubr.msk.bf16.mxu1 %vm211_vm0, %v557_v23 }
  0x3d   :  { %293 = vmatmul.mubr.bf16.gmra.mrb[12].mxu0 %v559_v24  ;;  %325 = vmatmul.mubr.bf16.gmra.mrb[12].mxu1 %v560_v25 }
  0xf8   :  { %v270_v27 = vpop.f32.mrb[0].mxu0  ;;  %v302_v28 = vpop.f32.mrb[0].mxu1 }
  0xf9   :  { %v391_v29 = vadd.f32 %v668_v26, %v270_v27  ;;  %v399_v30 = vadd.f32 %v668_v26, %v302_v28  ;;  %v272_v31 = vpop.f32.mrb[1].mxu0  ;;  %v304_v32 = vpop.f32.mrb[1].mxu1 }
  0xfa   :  { %v273_v33 = vpop.f32.mrb[2].mxu0  ;;  %v305_v34 = vpop.f32.mrb[2].mxu1 }
  0xfb   :  { %vm407_vm1 = vcmp.ge.f32.partialorder %v391_v29, 0.0  ;;  %v423_v35 = vmul.f32 0.2, %v391_v29  ;;  %vm415_vm2 = vcmp.ge.f32.partialorder %v399_v30, 0.0  ;;  %v431_v36 = vmul.f32 0.2, %v399_v30 }
  0xfc   :  { %v392_v37 = vadd.f32 %v668_v26, %v273_v33  ;;  %v400_v38 = vadd.f32 %v668_v26, %v305_v34  ;;  %v275_v39 = vpop.f32.mrb[3].mxu0  ;;  %v307_v40 = vpop.f32.mrb[3].mxu1 }
  0xfd   :  { %v439_v41 = vsel %vm407_vm1, %v391_v29, %v423_v35  ;;  %v447_v42 = vsel %vm415_vm2, %v399_v30, %v431_v36 }
  0xfe   :  { %455 = vst [vmem:[%s737_s3] sm:$0xff] %v439_v41  ;;  %463 = vst [vmem:[%s737_s3 + $0x40] sm:$0xff] %v447_v42  ;;  %vm408_vm3 = vcmp.ge.f32.partialorder %v392_v37, 0.0  ;;  %v424_v43 = vmul.f32 0.2, %v392_v37  ;;  %vm416_vm4 = vcmp.ge.f32.partialorder %v400_v38, 0.0 }
  0xff   :  { %v432_v44 = vmul.f32 0.2, %v400_v38 }
 0x100   :  { %v440_v45 = vsel %vm408_vm3, %v392_v37, %v424_v43  ;;  %v278_v47 = vpop.f32.mrb[4].mxu0  ;;  %v310_v48 = vpop.f32.mrb[4].mxu1 }
 0x101   :  { %v448_v46 = vsel %vm416_vm4, %v400_v38, %v432_v44  ;;  %456 = vst [vmem:[%s737_s3 + $0x8] sm:$0xff] %v440_v45  ;;  %v393_v49 = vadd.f32 %v668_v26, %v278_v47  ;;  %v401_v50 = vadd.f32 %v668_v26, %v310_v48  ;;  %v280_v51 = vpop.f32.mrb[5].mxu0  ;;  %v312_v52 = vpop.f32.mrb[5].mxu1 }
 0x102   :  { %464 = vst [vmem:[%s737_s3 + $0x48] sm:$0xff] %v448_v46  ;;  %v281_v53 = vpop.f32.mrb[6].mxu0  ;;  %v313_v54 = vpop.f32.mrb[6].mxu1 }
 0x103   :  { %vm409_vm5 = vcmp.ge.f32.partialorder %v393_v49, 0.0  ;;  %v425_v55 = vmul.f32 0.2, %v393_v49  ;;  %vm417_vm6 = vcmp.ge.f32.partialorder %v401_v50, 0.0  ;;  %v433_v56 = vmul.f32 0.2, %v401_v50 }
 0x104   :  { %v394_v57 = vadd.f32 %v668_v26, %v281_v53  ;;  %v402_v58 = vadd.f32 %v668_v26, %v313_v54  ;;  %v283_v59 = vpop.f32.mrb[7].mxu0  ;;  %v315_v60 = vpop.f32.mrb[7].mxu1 }
 0x105   :  { %v441_v61 = vsel %vm409_vm5, %v393_v49, %v425_v55  ;;  %v449_v62 = vsel %vm417_vm6, %v401_v50, %v433_v56 }
 0x106   :  { %457 = vst [vmem:[%s737_s3 + $0x10] sm:$0xff] %v441_v61  ;;  %465 = vst [vmem:[%s737_s3 + $0x50] sm:$0xff] %v449_v62  ;;  %vm410_vm7 = vcmp.ge.f32.partialorder %v394_v57, 0.0  ;;  %v426_v63 = vmul.f32 0.2, %v394_v57  ;;  %vm418_vm8 = vcmp.ge.f32.partialorder %v402_v58, 0.0 }
 0x107   :  { %v434_v0 = vmul.f32 0.2, %v402_v58 }
 0x108   :  { %v442_v1 = vsel %vm410_vm7, %v394_v57, %v426_v63  ;;  %v286_v3 = vpop.f32.mrb[8].mxu0  ;;  %v318_v4 = vpop.f32.mrb[8].mxu1 }
 0x109   :  { %v450_v2 = vsel %vm418_vm8, %v402_v58, %v434_v0  ;;  %458 = vst [vmem:[%s737_s3 + $0x18] sm:$0xff] %v442_v1  ;;  %v395_v5 = vadd.f32 %v668_v26, %v286_v3  ;;  %v403_v6 = vadd.f32 %v668_v26, %v318_v4  ;;  %v288_v7 = vpop.f32.mrb[9].mxu0  ;;  %v320_v8 = vpop.f32.mrb[9].mxu1 }
 0x10a   :  { %466 = vst [vmem:[%s737_s3 + $0x58] sm:$0xff] %v450_v2  ;;  %v289_v9 = vpop.f32.mrb[10].mxu0  ;;  %v321_v10 = vpop.f32.mrb[10].mxu1 }
 0x10b   :  { %vm411_vm9 = vcmp.ge.f32.partialorder %v395_v5, 0.0  ;;  %v427_v11 = vmul.f32 0.2, %v395_v5  ;;  %vm419_vm10 = vcmp.ge.f32.partialorder %v403_v6, 0.0  ;;  %v435_v12 = vmul.f32 0.2, %v403_v6 }
 0x10c   :  { %v396_v13 = vadd.f32 %v668_v26, %v289_v9  ;;  %v404_v14 = vadd.f32 %v668_v26, %v321_v10  ;;  %v291_v15 = vpop.f32.mrb[11].mxu0  ;;  %v323_v16 = vpop.f32.mrb[11].mxu1 }
 0x10d   :  { %v443_v17 = vsel %vm411_vm9, %v395_v5, %v427_v11  ;;  %v451_v18 = vsel %vm419_vm10, %v403_v6, %v435_v12 }
 0x10e   :  { %459 = vst [vmem:[%s737_s3 + $0x20] sm:$0xff] %v443_v17  ;;  %467 = vst [vmem:[%s737_s3 + $0x60] sm:$0xff] %v451_v18  ;;  %vm412_vm11 = vcmp.ge.f32.partialorder %v396_v13, 0.0  ;;  %v428_v19 = vmul.f32 0.2, %v396_v13  ;;  %vm420_vm12 = vcmp.ge.f32.partialorder %v404_v14, 0.0 }
 0x10f   :  { %v436_v20 = vmul.f32 0.2, %v404_v14 }
 0x110   :  { %v444_v21 = vsel %vm412_vm11, %v396_v13, %v428_v19  ;;  %v294_v23 = vpop.f32.mrb[12].mxu0  ;;  %v326_v24 = vpop.f32.mrb[12].mxu1 }
 0x111   :  { %v452_v22 = vsel %vm420_vm12, %v404_v14, %v436_v20  ;;  %460 = vst [vmem:[%s737_s3 + $0x28] sm:$0xff] %v444_v21  ;;  %v397_v25 = vadd.f32 %v668_v26, %v294_v23  ;;  %v405_v27 = vadd.f32 %v668_v26, %v326_v24  ;;  %v296_v28 = vpop.f32.mrb[13].mxu0  ;;  %v328_v29 = vpop.f32.mrb[13].mxu1 }
 0x112   :  { %468 = vst [vmem:[%s737_s3 + $0x68] sm:$0xff] %v452_v22  ;;  %v297_v30 = vpop.f32.mrb[14].mxu0  ;;  %v329_v31 = vpop.f32.mrb[14].mxu1 }
 0x113   :  { %vm413_vm13 = vcmp.ge.f32.partialorder %v397_v25, 0.0  ;;  %v429_v32 = vmul.f32 0.2, %v397_v25  ;;  %vm421_vm14 = vcmp.ge.f32.partialorder %v405_v27, 0.0  ;;  %v437_v33 = vmul.f32 0.2, %v405_v27 }
 0x114   :  { %v398_v34 = vadd.f32 %v668_v26, %v297_v30  ;;  %v406_v35 = vadd.f32 %v668_v26, %v329_v31  ;;  %v299_v36 = vpop.f32.mrb[15].mxu0  ;;  %v331_v37 = vpop.f32.mrb[15].mxu1 }
 0x115   :  { %v445_v38 = vsel %vm413_vm13, %v397_v25, %v429_v32  ;;  %v453_v39 = vsel %vm421_vm14, %v405_v27, %v437_v33 }
 0x116   :  { %461 = vst [vmem:[%s737_s3 + $0x30] sm:$0xff] %v445_v38  ;;  %469 = vst [vmem:[%s737_s3 + $0x70] sm:$0xff] %v453_v39  ;;  %vm414_vm15 = vcmp.ge.f32.partialorder %v398_v34, 0.0  ;;  %v430_v40 = vmul.f32 0.2, %v398_v34  ;;  %vm422_vm0 = vcmp.ge.f32.partialorder %v406_v35, 0.0 }
 0x117   :  { %v438_v41 = vmul.f32 0.2, %v406_v35 }
 0x118   :  { %v446_v42 = vsel %vm414_vm15, %v398_v34, %v430_v40 }
 0x119   :  { %v454_v43 = vsel %vm422_vm0, %v406_v35, %v438_v41  ;;  %462 = vst [vmem:[%s737_s3 + $0x38] sm:$0xff] %v446_v42 }
 0x11a   :  { %470 = vst [vmem:[%s737_s3 + $0x78] sm:$0xff] %v454_v43 }

// kernel: resblock_forward.5
= control target key start
LH: loop header
LB: loop body
LE: loop exit
PB: predicated region body
PF: predicated region fallthrough
CT: control target
= control target key end

     0   :  { %vm139_vm0 = vcmask 523264   ;;  %s600_s1 = inlined_call_operand.vmem [shape: bf16[64,128], index: 1, kind: input, shape index: {}]   ;;  %s601_s0 = inlined_call_operand.vmem [shape: bf16[128,64], index: 0, kind: input, shape index: {}]   ;;  %s602_s2 = inlined_call_operand.vmem [shape: f32[128,128], index: 2, kind: input, shape index: {}]   ;;  %s603_s3 = inlined_call_operand.vmem [shape: f32[128,128], index: 3, kind: output, shape index: {}]  }
   0x1   :  { %v428_v0 = vld [vmem:[%s600_s1] sm:$0xff]   ;;  %v429_v1 = vld [vmem:[%s600_s1 + $0x8] sm:$0xff]   ;;  %v430_v2 = vld [vmem:[%s600_s1 + $0x10] sm:$0xff]  }
   0x2   :  { %396 = vmatprep.subr.bf16.mxu0 %v428_v0  ;;  %420 = vmatprep.subr.bf16.mxu1 %v428_v0  ;;  %v432_v3 = vld [vmem:[%s601_s0] sm:$0xff]   ;;  %v431_v5 = vld [vmem:[%s600_s1 + $0x18] sm:$0xff]   ;;  %v434_v6 = vld [vmem:[%s601_s0 + $0x8] sm:$0xff]  }
   0x3   :  { %397 = vmatpush3.bf16.msra.mxu0 %v428_v0  ;;  %424 = vmatpush3.bf16.msra.mxu1 %v428_v0  ;;  %v433_v4 = vld [vmem:[%s601_s0 + $0x20] sm:$0xff]   ;;  %v435_v7 = vld [vmem:[%s601_s0 + $0x28] sm:$0xff]   ;;  %v436_v8 = vld [vmem:[%s601_s0 + $0x10] sm:$0xff]  }
   0x4   :  { %398 = vmatprep.subr.bf16.mxu0 %v429_v1  ;;  %421 = vmatprep.subr.bf16.mxu1 %v429_v1  ;;  %v437_v9 = vld [vmem:[%s601_s0 + $0x30] sm:$0xff]   ;;  %v438_v10 = vld [vmem:[%s601_s0 + $0x18] sm:$0xff]   ;;  %v312_v14 = vld [vmem:[%s602_s2] sm:$0xff] }
   0x5   :  { %404 = vmatprep.mubr.msk.bf16.mxu0 %vm139_vm0, %v432_v3  ;;  %412 = vmatprep.mubr.msk.bf16.mxu1 %vm139_vm0, %v433_v4  ;;  %v439_v11 = vld [vmem:[%s601_s0 + $0x38] sm:$0xff]   ;;  %v314_v12 = vld [vmem:[%s602_s2 + $0x10] sm:$0xff]  ;;  %v320_v15 = vld [vmem:[%s602_s2 + $0x40] sm:$0xff] }
   0x6   :  { %v322_v13 = vld [vmem:[%s602_s2 + $0x50] sm:$0xff]  ;;  %v315_v18 = vld [vmem:[%s602_s2 + $0x18] sm:$0xff]  ;;  %v313_v24 = vld [vmem:[%s602_s2 + $0x8] sm:$0xff] }
   0x7   :  { %399 = vmatpush3.bf16.msra.mxu0 %v429_v1  ;;  %425 = vmatpush3.bf16.msra.mxu1 %v429_v1  ;;  %v323_v19 = vld [vmem:[%s602_s2 + $0x58] sm:$0xff]  ;;  %v321_v25 = vld [vmem:[%s602_s2 + $0x48] sm:$0xff]  ;;  %v318_v36 = vld [vmem:[%s602_s2 + $0x30] sm:$0xff] }
   0x8   :  { %400 = vmatprep.subr.bf16.mxu0 %v430_v2  ;;  %422 = vmatprep.subr.bf16.mxu1 %v430_v2  ;;  %v326_v37 = vld [vmem:[%s602_s2 + $0x70] sm:$0xff]  ;;  %v316_v38 = vld [vmem:[%s602_s2 + $0x20] sm:$0xff]  ;;  %v319_v42 = vld [vmem:[%s602_s2 + $0x38] sm:$0xff] }
   0x9   :  { %v324_v39 = vld [vmem:[%s602_s2 + $0x60] sm:$0xff]  ;;  %v327_v43 = vld [vmem:[%s602_s2 + $0x78] sm:$0xff]  ;;  %v317_v48 = vld [vmem:[%s602_s2 + $0x28] sm:$0xff] }
   0xa   :  { %v325_v49 = vld [vmem:[%s602_s2 + $0x68] sm:$0xff] }
   0xb   :  { %401 = vmatpush3.bf16.msra.mxu0 %v430_v2  ;;  %426 = vmatpush3.bf16.msra.mxu1 %v430_v2 }
   0xc   :  { %402 = vmatprep.subr.bf16.mxu0 %v431_v5  ;;  %423 = vmatprep.subr.bf16.mxu1 %v431_v5 }
   0xf   :  { %403 = vmatpush3.bf16.msra.mxu0 %v431_v5  ;;  %427 = vmatpush3.bf16.msra.mxu1 %v431_v5 }
  0x12   :  { %405 = vmatmul.mubr.msk.bf16.vlgmr.msra.gmra.mrb[0].mxu0 %vm139_vm0, %v434_v6  ;;  %413 = vmatmul.mubr.msk.bf16.vlgmr.msra.gmra.mrb[0].mxu1 %vm139_vm0, %v435_v7 }
  0x13   :  { %408 = vmatprep.mubr.msk.bf16.mxu0 %vm139_vm0, %v436_v8  ;;  %416 = vmatprep.mubr.msk.bf16.mxu1 %vm139_vm0, %v437_v9 }
  0x1a   :  { %409 = vmatmul.mubr.msk.bf16.gmra.mrb[4].mxu0 %vm139_vm0, %v438_v10  ;;  %417 = vmatmul.mubr.msk.bf16.gmra.mrb[4].mxu1 %vm139_vm0, %v439_v11 }
  0xe5   :  { %v406_v16 = vpop.f32.mrb[0].mxu0  ;;  %v414_v17 = vpop.f32.mrb[0].mxu1 }
  0xe6   :  { %v330_v20 = vadd.f32 %v406_v16, %v314_v12  ;;  %v338_v21 = vadd.f32 %v414_v17, %v322_v13  ;;  %v198_v22 = vpop.f32.mrb[1].mxu0  ;;  %v230_v23 = vpop.f32.mrb[1].mxu1 }
  0xe7   :  { %v328_v26 = vadd.f32 %v312_v14, %v198_v22  ;;  %v336_v27 = vadd.f32 %v320_v15, %v230_v23  ;;  %v407_v28 = vpop.f32.mrb[2].mxu0  ;;  %v415_v29 = vpop.f32.mrb[2].mxu1 }
  0xe8   :  { %346 = vst [vmem:[%s603_s3 + $0x10] sm:$0xff] %v330_v20  ;;  %354 = vst [vmem:[%s603_s3 + $0x50] sm:$0xff] %v338_v21  ;;  %v331_v30 = vadd.f32 %v407_v28, %v315_v18  ;;  %v339_v31 = vadd.f32 %v415_v29, %v323_v19  ;;  %v201_v32 = vpop.f32.mrb[3].mxu0  ;;  %v233_v33 = vpop.f32.mrb[3].mxu1 }
  0xe9   :  { %344 = vst [vmem:[%s603_s3] sm:$0xff] %v328_v26  ;;  %352 = vst [vmem:[%s603_s3 + $0x40] sm:$0xff] %v336_v27  ;;  %v329_v34 = vadd.f32 %v313_v24, %v201_v32  ;;  %v337_v35 = vadd.f32 %v321_v25, %v233_v33 }
  0xea   :  { %347 = vst [vmem:[%s603_s3 + $0x18] sm:$0xff] %v331_v30  ;;  %355 = vst [vmem:[%s603_s3 + $0x58] sm:$0xff] %v339_v31 }
  0xeb   :  { %345 = vst [vmem:[%s603_s3 + $0x8] sm:$0xff] %v329_v34  ;;  %353 = vst [vmem:[%s603_s3 + $0x48] sm:$0xff] %v337_v35 }
  0xed   :  { %v410_v40 = vpop.f32.mrb[4].mxu0  ;;  %v418_v41 = vpop.f32.mrb[4].mxu1 }
  0xee   :  { %v334_v44 = vadd.f32 %v410_v40, %v318_v36  ;;  %v342_v45 = vadd.f32 %v418_v41, %v326_v37  ;;  %v214_v46 = vpop.f32.mrb[5].mxu0  ;;  %v246_v47 = vpop.f32.mrb[5].mxu1 }
  0xef   :  { %v332_v50 = vadd.f32 %v316_v38, %v214_v46  ;;  %v340_v51 = vadd.f32 %v324_v39, %v246_v47  ;;  %v411_v52 = vpop.f32.mrb[6].mxu0  ;;  %v419_v53 = vpop.f32.mrb[6].mxu1 }
  0xf0   :  { %350 = vst [vmem:[%s603_s3 + $0x30] sm:$0xff] %v334_v44  ;;  %358 = vst [vmem:[%s603_s3 + $0x70] sm:$0xff] %v342_v45  ;;  %v335_v54 = vadd.f32 %v411_v52, %v319_v42  ;;  %v343_v55 = vadd.f32 %v419_v53, %v327_v43  ;;  %v217_v56 = vpop.f32.mrb[7].mxu0  ;;  %v249_v57 = vpop.f32.mrb[7].mxu1 }
  0xf1   :  { %348 = vst [vmem:[%s603_s3 + $0x20] sm:$0xff] %v332_v50  ;;  %356 = vst [vmem:[%s603_s3 + $0x60] sm:$0xff] %v340_v51  ;;  %v333_v58 = vadd.f32 %v317_v48, %v217_v56  ;;  %v341_v59 = vadd.f32 %v325_v49, %v249_v57 }
  0xf2   :  { %351 = vst [vmem:[%s603_s3 + $0x38] sm:$0xff] %v335_v54  ;;  %359 = vst [vmem:[%s603_s3 + $0x78] sm:$0xff] %v343_v55 }
  0xf3   :  { %349 = vst [vmem:[%s603_s3 + $0x28] sm:$0xff] %v333_v58  ;;  %357 = vst [vmem:[%s603_s3 + $0x68] sm:$0xff] %v341_v59 }

</bundles_post_ra>
